<compile_context>
chip_gen: v7x
topology: tpu7x:2x2x1
jax: 0.10.0
libtpu: 0.0.40
codegen_flags: <defaults>
</compile_context>

<pallas_src>
import jax
import jax.numpy as jnp
from jax.experimental import pallas as pl
from jax.experimental.pallas import tpu as pltpu


def _upsample_kernel(x_mid_ref, x_top_ref, x_bot_ref, w_ref, b_ref, out_ref):
    # x_mid_ref : (1, TH, W, C)   rows [h*TH, h*TH+TH) of the NHWC input
    # x_top_ref : (1, 1,  W, C)   row  h*TH-1  (index clamped; zeroed when h==0)
    # x_bot_ref : (1, 1,  W, C)   row  h*TH+TH (index clamped; zeroed when last)
    # w_ref     : (9C, 4C) bf16   zero-padded fused weights (window t -> phase p)
    # b_ref     : (1, 4C)  f32    bias replicated per phase
    # out_ref   : (1, TH, 2, W, 2C)  phase-major output tile
    _, TH, W, C = x_mid_ref.shape
    dt = x_mid_ref.dtype
    h = pl.program_id(1)
    nh = pl.num_programs(1)

    x_mid = x_mid_ref[0]                                    # (TH, W, C)
    top = x_top_ref[0] * (h > 0).astype(dt)                 # (1, W, C)
    bot = x_bot_ref[0] * (h < nh - 1).astype(dt)            # (1, W, C)

    # --- row-shifted slabs (dy = 0,1,2 <-> input rows r-1, r, r+1) ------------
    if TH > 1:
        r0 = jnp.concatenate([top, x_mid[:TH - 1]], axis=0)  # rows r-1
        r2 = jnp.concatenate([x_mid[1:], bot], axis=0)       # rows r+1
    else:
        r0, r2 = top, bot
    slabs = (r0, x_mid, r2)

    # --- column-shifted windows (dx = 0,1,2 <-> cols cw-1, cw, cw+1) ----------
    zc = jnp.zeros((TH, 1, C), dt)
    wins = []
    for s in slabs:
        left = jnp.concatenate([zc, s[:, :W - 1, :]], axis=1)   # cols cw-1
        right = jnp.concatenate([s[:, 1:, :], zc], axis=1)      # cols cw+1
        wins += [left, s, right]                                 # t = 3*dy + dx

    # --- single fused MXU matmul for all 4 output phases ----------------------
    patch = jnp.concatenate(wins, axis=-1).reshape(TH * W, 9 * C)
    y = jnp.dot(patch.astype(jnp.bfloat16), w_ref[...],
                preferred_element_type=jnp.float32)          # (TH*W, 4C) f32
    y = (y + b_ref[0]).reshape(TH, W, 4 * C)

    # --- phase-major stores (contiguous per row; no interleave materialized) --
    out_ref[0, :, 0, :, :] = y[:, :, :2 * C].astype(out_ref.dtype)   # ph = 0
    out_ref[0, :, 1, :, :] = y[:, :, 2 * C:].astype(out_ref.dtype)   # ph = 1


def _vmem_limit_bytes():
    """Generation-aware scoped-VMEM limit: ~half of physical VMEM
    (~32 MiB on v7x's 64 MiB, 64 MiB on v5e/v6e's 128 MiB)."""
    try:
        cap = int(pltpu.get_tpu_info().vmem_capacity_bytes)
    except Exception:
        cap = 64 * 2 ** 20          # conservative (v7x-sized) fallback
    return max(min(cap // 2, 64 * 2 ** 20), 16 * 2 ** 20)


def _pick_tile_h(N, H, W, C, budget):
    """Largest divisor of H whose per-step working set fits `budget`, capped so
    the (N, H/TH) grid has >= 2 steps (keeps v7x's second TensorCore busy)."""
    def rup(x, m):
        return -(-x // m) * m

    Wp = rup(W, 8)
    c_in = rup(C, 128)
    c_out = rup(2 * C, 128)
    c_patch = rup(9 * C, 128)
    c_y = rup(4 * C, 128)
    w_bytes = 2 * 2 * rup(9 * C, 8) * rup(4 * C, 128)       # bf16, double-buffered

    max_th = H if N >= 2 else max(H // 2, 1)
    best = 1
    for th in range(1, H + 1):
        if H % th or th > max_th:
            continue
        in_blk = (th + 2) * Wp * c_in                        # mid + 2 halo rows
        out_blk = 2 * th * Wp * c_out                        # (TH,2,W,2C) block
        # slabs + 6 shifted windows + patch (f32+bf16) + matmul result
        live = th * Wp * (10 * c_in + 2 * c_patch + 2 * c_y)
        need = 4 * (2 * in_blk + 2 * out_blk + live) + w_bytes
        if need <= budget:
            best = th
    return best


def _pack_weights(weight, out_dtype=jnp.bfloat16):
    """(Cin, Cout, 4, 4) ConvTranspose2d weight -> zero-padded (9*Cin, 4*Cout).

    Row block t = 3*dy + dx (window at spatial offset (dy-1, dx-1)); column
    block p = 2*ph + pw (output phase).  For phase (ph, pw) only the four
    windows (dy, dx) = (ph+a, pw+b), a,b in {0,1} are non-zero and hold
    weight[:, :, 3-ph-2a, 3-pw-2b]; all other entries are zero.
    """
    Cin, Cout = weight.shape[0], weight.shape[1]
    w9 = jnp.zeros((9 * Cin, 4 * Cout), jnp.float32)
    for ph in range(2):
        for pw in range(2):
            p = 2 * ph + pw
            for a in range(2):
                for b in range(2):
                    t = 3 * (ph + a) + (pw + b)
                    tap = weight[:, :, 3 - ph - 2 * a, 3 - pw - 2 * b]
                    w9 = w9.at[t * Cin:(t + 1) * Cin,
                               p * Cout:(p + 1) * Cout].set(tap)
    return w9.astype(out_dtype)


def upsample_pdearena(x_nchw, weight, bias, *, tile_h=None):
    """ConvTranspose2d(C, C, (4,4), stride=(2,2), padding=(1,1)) forward.

    x_nchw : (N, C, H, W) float32
    weight : (C_in, C_out, 4, 4) float32 (PyTorch ConvTranspose2d layout)
    bias   : (C_out,) float32
    returns: (N, C, 2H, 2W) float32
    """
    N, C, H, W = x_nchw.shape
    assert weight.shape == (C, C, 4, 4), weight.shape

    vmem_limit = _vmem_limit_bytes()
    TH = tile_h if tile_h is not None else _pick_tile_h(
        N, H, W, C, budget=(vmem_limit * 2) // 3)
    assert H % TH == 0, (H, TH)
    nh = H // TH

    x = jnp.transpose(x_nchw, (0, 2, 3, 1)).astype(jnp.float32)  # NHWC
    w9 = _pack_weights(weight)                                   # (9C, 4C) bf16
    b4 = jnp.concatenate([bias.astype(jnp.float32)] * 4).reshape(1, 4 * C)

    out5 = pl.pallas_call(
        _upsample_kernel,
        out_shape=jax.ShapeDtypeStruct((N, H, 2, W, 2 * C), jnp.float32),
        grid_spec=pltpu.PrefetchScalarGridSpec(
            num_scalar_prefetch=0,
            grid=(N, nh),
            in_specs=[
                # main tile rows [h*TH, h*TH+TH)
                pl.BlockSpec((1, TH, W, C), lambda n, hh: (n, hh, 0, 0)),
                # halo row above (clamped; zeroed in-kernel at h == 0)
                pl.BlockSpec((1, 1, W, C),
                             lambda n, hh: (n, jnp.maximum(hh * TH - 1, 0), 0, 0)),
                # halo row below (clamped; zeroed in-kernel at the last tile)
                pl.BlockSpec((1, 1, W, C),
                             lambda n, hh: (n, jnp.minimum(hh * TH + TH, H - 1), 0, 0)),
                pl.BlockSpec((9 * C, 4 * C), lambda n, hh: (0, 0)),
                pl.BlockSpec((1, 4 * C), lambda n, hh: (0, 0)),
            ],
            out_specs=pl.BlockSpec((1, TH, 2, W, 2 * C),
                                   lambda n, hh: (n, hh, 0, 0, 0)),
        ),
        compiler_params=pltpu.CompilerParams(
            dimension_semantics=("parallel", "parallel"),
            vmem_limit_bytes=vmem_limit,
        ),
    )(x, x, x, w9, b4)

    # (N,H,2,W,2C) -> (N,2H,2W,C): contiguous dimension merges (free reshape).
    out_nhwc = out5.reshape(N, 2 * H, 2 * W, C)
    # TODO(synk): an NCHW-native kernel would remove these two HBM transpose
    #             passes; kept NHWC internally for robustness.
    return jnp.transpose(out_nhwc, (0, 3, 1, 2))


def _reference(x_nchw, weight, bias):
    # ConvTranspose2d == conv on the zero-dilated input with flipped,
    # channel-swapped kernel and padding k-1-p = 2.
    w_flip = jnp.transpose(weight[:, :, ::-1, ::-1], (1, 0, 2, 3))
    y = jax.lax.conv_general_dilated(
        x_nchw, w_flip,
        window_strides=(1, 1),
        padding=((2, 2), (2, 2)),
        lhs_dilation=(2, 2),
        dimension_numbers=("NCHW", "OIHW", "NCHW"),
    )
    return y + bias[None, :, None, None]


if __name__ == "__main__":
    N, C, H, W = 2, 4, 16, 16
    key = jax.random.PRNGKey(0)
    kx, kw, kb = jax.random.split(key, 3)

    x = jax.random.normal(kx, (N, C, H, W), dtype=jnp.float32)
    fan = C * 4 * 4
    bound = 1.0 / (fan ** 0.5)
    weight = jax.random.uniform(kw, (C, C, 4, 4), jnp.float32, -bound, bound)
    bias = jax.random.uniform(kb, (C,), jnp.float32, -bound, bound)

    ref = _reference(x, weight, bias)

    # default tile plus multi-tile configs that exercise the halo / edge logic.
    for th in (None, 8, 4):
        out = jax.block_until_ready(upsample_pdearena(x, weight, bias, tile_h=th))
        assert out.shape == (N, C, 2 * H, 2 * W), (th, out.shape)
        err = float(jnp.max(jnp.abs(out - ref)))
        # bf16 MXU operands with f32 accumulation -> relaxed tolerance.
        assert err < 3e-2, (th, err)

    print("KERNEL_OK")
</pallas_src>

<mosaic_0001>
module attributes {stable_mosaic.version = 11 : i64} {
  func.func @_upsample_kernel(%arg0: i32, %arg1: i32, %arg2: memref<1x16x16x4xf32, #tpu.memory_space<vmem>>, %arg3: memref<1x1x16x4xf32, #tpu.memory_space<vmem>>, %arg4: memref<1x1x16x4xf32, #tpu.memory_space<vmem>>, %arg5: memref<36x16xbf16, #tpu.memory_space<vmem>>, %arg6: memref<1x16xf32, #tpu.memory_space<vmem>>, %arg7: memref<1x16x2x16x8xf32, #tpu.memory_space<vmem>>) attributes {dimension_semantics = [#tpu.dimension_semantics<parallel>, #tpu.dimension_semantics<parallel>], iteration_bounds = array<i64: 2, 1>, scalar_prefetch = 0 : i64, scratch_operands = 0 : i64, tpu.core_type = #tpu.core_type<tc>, window_params = [{transform_indices = @transform_0, window_bounds = array<i64: 1, 16, 16, 4>}, {transform_indices = @transform_1, window_bounds = array<i64: 1, 1, 16, 4>}, {transform_indices = @transform_2, window_bounds = array<i64: 1, 1, 16, 4>}, {pipeline_mode = #tpu.pipeline_mode<synchronous>, transform_indices = @transform_3, window_bounds = array<i64: 36, 16>}, {pipeline_mode = #tpu.pipeline_mode<synchronous>, transform_indices = @transform_4, window_bounds = array<i64: 1, 16>}, {transform_indices = @transform_5, window_bounds = array<i64: 1, 16, 2, 16, 8>}]} {
    %c0 = arith.constant 0 : index
    %c0_0 = arith.constant 0 : index
    %c0_1 = arith.constant 0 : index
    %c0_2 = arith.constant 0 : index
    %0 = vector.load %arg2[%c0, %c0_0, %c0_1, %c0_2] : memref<1x16x16x4xf32, #tpu.memory_space<vmem>>, vector<1x16x16x4xf32>
    %1 = vector.shape_cast %0 : vector<1x16x16x4xf32> to vector<16x16x4xf32>
    %c0_3 = arith.constant 0 : index
    %c0_4 = arith.constant 0 : index
    %c0_5 = arith.constant 0 : index
    %c0_6 = arith.constant 0 : index
    %2 = vector.load %arg3[%c0_3, %c0_4, %c0_5, %c0_6] : memref<1x1x16x4xf32, #tpu.memory_space<vmem>>, vector<1x1x16x4xf32>
    %3 = vector.shape_cast %2 : vector<1x1x16x4xf32> to vector<1x16x4xf32>
    %c0_i32 = arith.constant 0 : i32
    %4 = arith.cmpi sgt, %arg1, %c0_i32 : i32
    %5 = arith.extui %4 : i1 to i32
    %6 = arith.sitofp %5 : i32 to f32
    %7 = vector.broadcast %6 : f32 to vector<1x16x4xf32>
    %8 = arith.mulf %3, %7 : vector<1x16x4xf32>
    %c0_7 = arith.constant 0 : index
    %c0_8 = arith.constant 0 : index
    %c0_9 = arith.constant 0 : index
    %c0_10 = arith.constant 0 : index
    %9 = vector.load %arg4[%c0_7, %c0_8, %c0_9, %c0_10] : memref<1x1x16x4xf32, #tpu.memory_space<vmem>>, vector<1x1x16x4xf32>
    %10 = vector.shape_cast %9 : vector<1x1x16x4xf32> to vector<1x16x4xf32>
    %c0_i32_11 = arith.constant 0 : i32
    %11 = arith.cmpi slt, %arg1, %c0_i32_11 : i32
    %12 = arith.extui %11 : i1 to i32
    %13 = arith.sitofp %12 : i32 to f32
    %14 = vector.broadcast %13 : f32 to vector<1x16x4xf32>
    %15 = arith.mulf %10, %14 : vector<1x16x4xf32>
    %16 = vector.extract_strided_slice %1 {offsets = [0, 0, 0], sizes = [15, 16, 4], strides = [1, 1, 1]} : vector<16x16x4xf32> to vector<15x16x4xf32>
    %17 = tpu.concatenate %8, %16 in 0 : vector<1x16x4xf32>, vector<15x16x4xf32> -> vector<16x16x4xf32>
    %18 = vector.extract_strided_slice %1 {offsets = [1, 0, 0], sizes = [15, 16, 4], strides = [1, 1, 1]} : vector<16x16x4xf32> to vector<15x16x4xf32>
    %19 = tpu.concatenate %18, %15 in 0 : vector<15x16x4xf32>, vector<1x16x4xf32> -> vector<16x16x4xf32>
    %cst = arith.constant 0.000000e+00 : f32
    %20 = vector.broadcast %cst : f32 to vector<16x1x4xf32>
    %21 = vector.extract_strided_slice %17 {offsets = [0, 0, 0], sizes = [16, 15, 4], strides = [1, 1, 1]} : vector<16x16x4xf32> to vector<16x15x4xf32>
    %22 = tpu.concatenate %20, %21 in 1 : vector<16x1x4xf32>, vector<16x15x4xf32> -> vector<16x16x4xf32>
    %23 = vector.extract_strided_slice %17 {offsets = [0, 1, 0], sizes = [16, 15, 4], strides = [1, 1, 1]} : vector<16x16x4xf32> to vector<16x15x4xf32>
    %24 = tpu.concatenate %23, %20 in 1 : vector<16x15x4xf32>, vector<16x1x4xf32> -> vector<16x16x4xf32>
    %25 = vector.extract_strided_slice %1 {offsets = [0, 0, 0], sizes = [16, 15, 4], strides = [1, 1, 1]} : vector<16x16x4xf32> to vector<16x15x4xf32>
    %26 = tpu.concatenate %20, %25 in 1 : vector<16x1x4xf32>, vector<16x15x4xf32> -> vector<16x16x4xf32>
    %27 = vector.extract_strided_slice %1 {offsets = [0, 1, 0], sizes = [16, 15, 4], strides = [1, 1, 1]} : vector<16x16x4xf32> to vector<16x15x4xf32>
    %28 = tpu.concatenate %27, %20 in 1 : vector<16x15x4xf32>, vector<16x1x4xf32> -> vector<16x16x4xf32>
    %29 = vector.extract_strided_slice %19 {offsets = [0, 0, 0], sizes = [16, 15, 4], strides = [1, 1, 1]} : vector<16x16x4xf32> to vector<16x15x4xf32>
    %30 = tpu.concatenate %20, %29 in 1 : vector<16x1x4xf32>, vector<16x15x4xf32> -> vector<16x16x4xf32>
    %31 = vector.extract_strided_slice %19 {offsets = [0, 1, 0], sizes = [16, 15, 4], strides = [1, 1, 1]} : vector<16x16x4xf32> to vector<16x15x4xf32>
    %32 = tpu.concatenate %31, %20 in 1 : vector<16x15x4xf32>, vector<16x1x4xf32> -> vector<16x16x4xf32>
    %33 = tpu.concatenate %22, %17, %24, %26, %1, %28, %30, %19, %32 in 2 : vector<16x16x4xf32>, vector<16x16x4xf32>, vector<16x16x4xf32>, vector<16x16x4xf32>, vector<16x16x4xf32>, vector<16x16x4xf32>, vector<16x16x4xf32>, vector<16x16x4xf32>, vector<16x16x4xf32> -> vector<16x16x36xf32>
    %34 = vector.shape_cast %33 : vector<16x16x36xf32> to vector<256x36xf32>
    %35 = arith.truncf %34 : vector<256x36xf32> to vector<256x36xbf16>
    %c0_12 = arith.constant 0 : index
    %c0_13 = arith.constant 0 : index
    %36 = vector.load %arg5[%c0_12, %c0_13] : memref<36x16xbf16, #tpu.memory_space<vmem>>, vector<36x16xbf16>
    %cst_14 = arith.constant dense<0.000000e+00> : vector<256x16xf32>
    %37 = tpu.matmul %35, %36, %cst_14 {dimension_numbers = #tpu.dot_dimension_numbers<[1], [0], [0], [1], [0, 0, 1, 1], [], []>} : vector<256x36xbf16>, vector<36x16xbf16>, vector<256x16xf32> -> vector<256x16xf32>
    %c0_15 = arith.constant 0 : index
    %c0_16 = arith.constant 0 : index
    %38 = vector.load %arg6[%c0_15, %c0_16] : memref<1x16xf32, #tpu.memory_space<vmem>>, vector<1x16xf32>
    %39 = vector.shape_cast %38 : vector<1x16xf32> to vector<16xf32>
    %40 = vector.shape_cast %39 : vector<16xf32> to vector<1x16xf32>
    %41 = vector.broadcast %40 : vector<1x16xf32> to vector<256x16xf32>
    %42 = arith.addf %37, %41 : vector<256x16xf32>
    %43 = vector.shape_cast %42 : vector<256x16xf32> to vector<16x16x16xf32>
    %44 = vector.extract_strided_slice %43 {offsets = [0, 0, 0], sizes = [16, 16, 8], strides = [1, 1, 1]} : vector<16x16x16xf32> to vector<16x16x8xf32>
    %c0_17 = arith.constant 0 : index
    %c0_18 = arith.constant 0 : index
    %c0_19 = arith.constant 0 : index
    %c0_20 = arith.constant 0 : index
    %c0_21 = arith.constant 0 : index
    %45 = vector.load %arg7[%c0_17, %c0_18, %c0_19, %c0_20, %c0_21] : memref<1x16x2x16x8xf32, #tpu.memory_space<vmem>>, vector<1x16x1x16x8xf32>
    %46 = vector.shape_cast %45 : vector<1x16x1x16x8xf32> to vector<16x16x8xf32>
    %47 = vector.shape_cast %44 : vector<16x16x8xf32> to vector<1x16x1x16x8xf32>
    tpu.vector_store %arg7[%c0_17, %c0_18, %c0_19, %c0_20, %c0_21], %47 {strides = array<i32>} : memref<1x16x2x16x8xf32, #tpu.memory_space<vmem>>, vector<1x16x1x16x8xf32>,
    %48 = vector.extract_strided_slice %43 {offsets = [0, 0, 8], sizes = [16, 16, 8], strides = [1, 1, 1]} : vector<16x16x16xf32> to vector<16x16x8xf32>
    %c0_22 = arith.constant 0 : index
    %c0_23 = arith.constant 0 : index
    %c1 = arith.constant 1 : index
    %c0_24 = arith.constant 0 : index
    %c0_25 = arith.constant 0 : index
    %49 = vector.load %arg7[%c0_22, %c0_23, %c1, %c0_24, %c0_25] : memref<1x16x2x16x8xf32, #tpu.memory_space<vmem>>, vector<1x16x1x16x8xf32>
    %50 = vector.shape_cast %49 : vector<1x16x1x16x8xf32> to vector<16x16x8xf32>
    %51 = vector.shape_cast %48 : vector<16x16x8xf32> to vector<1x16x1x16x8xf32>
    tpu.vector_store %arg7[%c0_22, %c0_23, %c1, %c0_24, %c0_25], %51 {strides = array<i32>} : memref<1x16x2x16x8xf32, #tpu.memory_space<vmem>>, vector<1x16x1x16x8xf32>,
    return
  }
  func.func @transform_0(%arg0: i32, %arg1: i32) -> (i32, i32, i32, i32) {
    %c0_i32 = arith.constant 0 : i32
    %c0_i32_0 = arith.constant 0 : i32
    %c0_i32_1 = arith.constant 0 : i32
    return %arg0, %arg1, %c0_i32, %c0_i32_0 : i32, i32, i32, i32
  }
  func.func @transform_1(%arg0: i32, %arg1: i32) -> (i32, i32, i32, i32) {
    %c16_i32 = arith.constant 16 : i32
    %0 = arith.muli %arg1, %c16_i32 : i32
    %c1_i32 = arith.constant 1 : i32
    %1 = arith.subi %0, %c1_i32 : i32
    %c0_i32 = arith.constant 0 : i32
    %2 = arith.maxsi %1, %c0_i32 : i32
    %c0_i32_0 = arith.constant 0 : i32
    %c0_i32_1 = arith.constant 0 : i32
    %c0_i32_2 = arith.constant 0 : i32
    return %arg0, %2, %c0_i32_0, %c0_i32_1 : i32, i32, i32, i32
  }
  func.func @transform_2(%arg0: i32, %arg1: i32) -> (i32, i32, i32, i32) {
    %c16_i32 = arith.constant 16 : i32
    %0 = arith.muli %arg1, %c16_i32 : i32
    %c16_i32_0 = arith.constant 16 : i32
    %1 = arith.addi %0, %c16_i32_0 : i32
    %c15_i32 = arith.constant 15 : i32
    %2 = arith.minsi %1, %c15_i32 : i32
    %c0_i32 = arith.constant 0 : i32
    %c0_i32_1 = arith.constant 0 : i32
    %c0_i32_2 = arith.constant 0 : i32
    return %arg0, %2, %c0_i32, %c0_i32_1 : i32, i32, i32, i32
  }
  func.func @transform_3(%arg0: i32, %arg1: i32) -> (i32, i32) {
    %c0_i32 = arith.constant 0 : i32
    %c0_i32_0 = arith.constant 0 : i32
    %c0_i32_1 = arith.constant 0 : i32
    return %c0_i32, %c0_i32_0 : i32, i32
  }
  func.func @transform_4(%arg0: i32, %arg1: i32) -> (i32, i32) {
    %c0_i32 = arith.constant 0 : i32
    %c0_i32_0 = arith.constant 0 : i32
    %c0_i32_1 = arith.constant 0 : i32
    return %c0_i32, %c0_i32_0 : i32, i32
  }
  func.func @transform_5(%arg0: i32, %arg1: i32) -> (i32, i32, i32, i32, i32) {
    %c0_i32 = arith.constant 0 : i32
    %c0_i32_0 = arith.constant 0 : i32
    %c0_i32_1 = arith.constant 0 : i32
    %c0_i32_2 = arith.constant 0 : i32
    return %arg0, %arg1, %c0_i32, %c0_i32_0, %c0_i32_1 : i32, i32, i32, i32, i32
  }
}

</mosaic_0001>

<bundles_post_ra>
// kernel: tpu_custom_call.1
= control target key start
LH: loop header
LB: loop body
LE: loop exit
PB: predicated region body
PF: predicated region fallthrough
CT: control target
= control target key end

     0   :  { %s3214_s18 = smov 0   ;;  %s3216_s19 = smov 0   ;;  %s4840_s0 = inlined_call_operand.vmem [shape: f32[2,16,16,4], index: 0, kind: input, shape index: {}]   ;;  %s4841_s1 = inlined_call_operand.vmem [shape: f32[2,16,16,4], index: 1, kind: input, shape index: {}]   ;;  %s4842_s2 = inlined_call_operand.vmem [shape: f32[2,16,16,4], index: 2, kind: input, shape index: {}]   ;;  %s4843_s3 = inlined_call_operand.vmem [shape: bf16[36,16], index: 3, kind: input, shape index: {}]   ;;  %s4844_s4 = inlined_call_operand.vmem [shape: f32[1,16], index: 4, kind: input, shape index: {}]   ;;  %s4845_s5 = inlined_call_operand.vmem [shape: f32[2,16,2,16,8], index: 5, kind: output, shape index: {}]  }
   0x1   :  { %s3218_s20 = smov 0  }
   0x2 LB: > { %s27_s21 = sadd.s32 1, %s3169_s19  ;;  %p2335_p0 = scmp.ge.s32.totalorder %s3173_s20, 1  ;;  %s3173_s20 = sphi %s3218_s20, %s15_s20   ;;  %s3169_s19 = sphi %s3216_s19, %s5024_s19   ;;  %s3165_s18 = sphi %s3214_s18, %s5023_s18  }
   0x3   : > { %p29_p1 = scmp.ge.s32.totalorder %s27_s21, 2  ;;  %p273_p2 = scmp.lt.s32.totalorder %s3173_s20, 3 }
   0x5   : > { %s5026_s21 = smov (%p29_p1, %s27_s21), 0  ;;  %p274_p3 = pnand %p2335_p0, %p273_p2 }
   0x7   : > { %277 = sbr.rel (%p274_p3) target bundleno = 739 (0x2e3), region = 40 }
   0xe   : > { %p338_p4 = scmp.lt.s32.totalorder %s3165_s18, 1  ;;  %s3175_s29 = smov 4   ;;  %vm571_vm0 = vcmask 1046528   ;;  %vm474_vm1 = vcmask 1040384   ;;  %vm1835_vm2 = vcmask 1041408   ;;  %vm1479_vm3 = vcmask 31744  }
   0xf   : > { %s3176_s30 = smov 8   ;;  %s3177_s6 = smov 12   ;;  %vm1512_vm4 = vcmask 64512   ;;  %vm1545_vm5 = vcmask 97280   ;;  %vm1578_vm6 = vcmask 130048   ;;  %vm1611_vm7 = vcmask 162816  }
  0x10   : > { %s5028_s18 = smov (!%p338_p4, %s3165_s18), 1  ;;  %s3178_s7 = smov 16   ;;  %vm1644_vm8 = vcmask 195584   ;;  %vm1677_vm9 = vcmask 228352   ;;  %vm1710_vm10 = vcmask 261120   ;;  %vm1786_vm11 = vcmask 293888  }
  0x11   : > { %s3235_s22 = sshll.u32 %s5028_s18, 8  ;;  %s3179_s8 = smov 20  }
  0x12   : > { %s3241_s25 = scalar_lea.vmem %s4840_s0, %s3235_s22  ;;  %s360_s28 = scalar_lea.vmem %s4841_s1, %s3235_s22 }
  0x13   : > { %v3244_v0 = vld [vmem:[%s3241_s25 + $0x10] sm:$0xff]  ;;  %v3247_v1 = vld [vmem:[%s3241_s25 + $0x18] sm:$0xff]  ;;  %v3250_v2 = vld [vmem:[%s3241_s25] sm:$0xff]  ;;  %s3180_s11 = smov 24   ;;  %s3181_s16 = smov 28  }
  0x14   : > { %v3258_v3 = vpack.i.bf16 %v3247_v1, %v3244_v0  ;;  %v3261_v4 = vld [vmem:[%s3241_s25 + $0x8] sm:$0xff]  ;;  %v3264_v5 = vld [vmem:[%s3241_s25 + $0x20] sm:$0xff]  ;;  %v3274_v8 = vld [vmem:[%s3241_s25 + $0x30] sm:$0xff]  ;;  %v575_v46 = vrot.slane %v3250_v2, 1  ;;  %v578_v52 = vrot.slane %v3244_v0, 1  ;;  %v579_v53 = vrot.slane %v3247_v1, 1 }
  0x15   : > { %v3267_v6 = vld [vmem:[%s3241_s25 + $0x28] sm:$0xff]  ;;  %v3271_v7 = vpack.i.bf16 %v3261_v4, %v3250_v2  ;;  %v3277_v9 = vld [vmem:[%s3241_s25 + $0x38] sm:$0xff]  ;;  %v426_v11 = vld [vmem:[%s360_s28] sm:$0xff]  ;;  %v576_v47 = vrot.slane %v3261_v4, 1  ;;  %v581_v55 = vrot.slane %v3264_v5, 1  ;;  %s3182_s17 = smov 32  }
  0x16   : > { %2508 = vrot.lane.b32.xlu1 %v3258_v3, %s3175_s29  ;;  %v3283_v10 = vpack.i.bf16 %v3267_v6, %v3264_v5  ;;  %v427_v12 = vld [vmem:[%s360_s28 + $0x8] sm:$0xff]  ;;  %v3289_v13 = vpack.i.bf16 %v3277_v9, %v3274_v8  ;;  %v3292_v14 = vld [vmem:[%s3241_s25 + $0x40] sm:$0xff]  ;;  %v3297_v16 = vmul.f32 0.0, %v426_v11  ;;  %v3318_v22 = vld [vmem:[%s3241_s25 + $0x50] sm:$0xff]  ;;  %v582_v56 = vrot.slane %v3267_v6, 1  ;;  %s2401_s23 = sadd.s32 240, %s3235_s22 }
  0x17   : > { %2503 = vrot.lane.b32.xlu0 %v3271_v7, %s3175_s29  ;;  %v3295_v15 = vld [vmem:[%s3241_s25 + $0x48] sm:$0xff]  ;;  %v3299_v17 = vmul.f32 0.0, %v427_v12  ;;  %v3312_v20 = vld [vmem:[%s3241_s25 + $0x60] sm:$0xff]  ;;  %v3321_v23 = vld [vmem:[%s3241_s25 + $0x58] sm:$0xff]  ;;  %v577_v58 = vsel %vm571_vm0, %v575_v46, %v576_v47  ;;  %v637_v59 = vsel %vm571_vm0, %v576_v47, 0.0  ;;  %v587_v62 = vrot.slane %v3292_v14, 1  ;;  %s377_s26 = scalar_lea.vmem %s4842_s2, %s2401_s23 }
  0x18   : > { %v3305_v18 = vpack.i.bf16 %v3295_v15, %v3292_v14  ;;  %v3315_v21 = vld [vmem:[%s3241_s25 + $0x68] sm:$0xff]  ;;  %v3332_v25 = vpack.i.bf16 %v3321_v23, %v3318_v22  ;;  %v3335_v26 = vld [vmem:[%s3241_s25 + $0x80] sm:$0xff]  ;;  %v3341_v28 = vld [vmem:[%s3241_s25 + $0x70] sm:$0xff]  ;;  %v572_v50 = vrot.slane %v3297_v16, 1  ;;  %v588_v63 = vrot.slane %v3295_v15, 1 }
  0x19   : > { %v2527_v19 = vpack.i.bf16 %v3299_v17, %v3297_v16  ;;  %v3327_v24 = vpack.i.bf16 %v3315_v21, %v3312_v20  ;;  %v3338_v27 = vld [vmem:[%s3241_s25 + $0x88] sm:$0xff]  ;;  %v3344_v29 = vld [vmem:[%s3241_s25 + $0x78] sm:$0xff]  ;;  %v3357_v32 = vld [vmem:[%s3241_s25 + $0xa0] sm:$0xff]  ;;  %v573_v51 = vrot.slane %v3299_v17, 1  ;;  %v580_v11 = vsel %vm571_vm0, %v578_v52, %v579_v53 }
  0x1a   : > { %2513 = vrot.lane.b32.xlu1 %v3283_v10, %s3175_s29  ;;  %4904 = vst [vmem:[#allocation2_spill] sm:$0xff] %v3305_v18  ;;  %4906 = vst [vmem:[#allocation4_spill] sm:$0xff] %v3332_v25  ;;  %v3350_v30 = vpack.i.bf16 %v3338_v27, %v3335_v26  ;;  %v2542_v31 = vpack.i.bf16 %v3344_v29, %v3341_v28  ;;  %v3360_v33 = vld [vmem:[%s3241_s25 + $0xa8] sm:$0xff]  ;;  %v3363_v34 = vld [vmem:[%s3241_s25 + $0x90] sm:$0xff]  ;;  %v638_v12 = vsel %vm571_vm0, %v579_v53, 0.0  ;;  %v639_v46 = vsel %vm571_vm0, %v582_v56, 0.0 }
  0x1b   : > { %2518 = vrot.lane.b32.xlu0 %v3289_v13, %s3175_s29  ;;  %4905 = vst [vmem:[#allocation3_spill] sm:$0xff] %v3327_v24  ;;  %v3366_v35 = vld [vmem:[%s3241_s25 + $0x98] sm:$0xff]  ;;  %v3372_v36 = vpack.i.bf16 %v3360_v33, %v3357_v32  ;;  %v3380_v38 = vld [vmem:[%s3241_s25 + $0xc0] sm:$0xff]  ;;  %v3383_v39 = vld [vmem:[%s3241_s25 + $0xc8] sm:$0xff]  ;;  %v574_v60 = vsel %vm571_vm0, %v572_v50, %v573_v51  ;;  %v636_v61 = vsel %vm571_vm0, %v573_v51, 0.0  ;;  %v584_v47 = vrot.slane %v3274_v8, 1 }
  0x1c   : > { %4907 = vst [vmem:[#allocation5_spill] sm:$0xff] %v3350_v30  ;;  %v3377_v37 = vpack.i.bf16 %v3366_v35, %v3363_v34  ;;  %v3386_v40 = vld [vmem:[%s3241_s25 + $0xb0] sm:$0xff]  ;;  %v3389_v41 = vld [vmem:[%s3241_s25 + $0xb8] sm:$0xff]  ;;  %v3395_v42 = vpack.i.bf16 %v3383_v39, %v3380_v38  ;;  %v3404_v44 = vld [vmem:[%s3241_s25 + $0xe0] sm:$0xff]  ;;  %v2582_v50 = vpack.i.bf16 %v636_v61, %v574_v60  ;;  %v585_v51 = vrot.slane %v3277_v9, 1 }
  0x1d   : > { %4908 = vst [vmem:[#allocation6_spill] sm:$0xff] %v3372_v36  ;;  %v3401_v43 = vpack.i.bf16 %v3389_v41, %v3386_v40  ;;  %v3407_v45 = vld [vmem:[%s3241_s25 + $0xe8] sm:$0xff]  ;;  %v3412_v48 = vld [vmem:[%s3241_s25 + $0xd0] sm:$0xff]  ;;  %v3415_v49 = vld [vmem:[%s3241_s25 + $0xd8] sm:$0xff]  ;;  %v590_v52 = vrot.slane %v3318_v22, 1  ;;  %v591_v53 = vrot.slane %v3321_v23, 1 }
  0x1e   : > { %2523 = vrot.lane.b32.xlu1 %v3305_v18, %s3175_s29  ;;  %4909 = vst [vmem:[#allocation7_spill] sm:$0xff] %v3377_v37  ;;  %4910 = vst [vmem:[#allocation8_spill] sm:$0xff] %v3395_v42  ;;  %v3425_v54 = vpack.i.bf16 %v3407_v45, %v3404_v44  ;;  %v3433_v57 = vpack.i.bf16 %v3415_v49, %v3412_v48  ;;  %v599_v60 = vrot.slane %v3335_v26, 1  ;;  %v600_v61 = vrot.slane %v3338_v27, 1  ;;  %v3486_v18 = vld [vmem:[%s3241_s25 + $0xf0] sm:$0xff] }
  0x1f   : > { %2528 = vrot.lane.b32.xlu0 %v2527_v19, %s3175_s29  ;;  %4911 = vst [vmem:[#allocation9_spill] sm:$0xff] %v3401_v43  ;;  %v3445_v19 = vpack.i.bf16 %v637_v59, %v577_v58  ;;  %v641_v58 = vsel %vm571_vm0, %v588_v63, 0.0  ;;  %v596_v59 = vrot.slane %v3341_v28, 1 }
  0x20   : > { %4912 = vst [vmem:[#allocation10_spill] sm:$0xff] %v3425_v54  ;;  %4913 = vst [vmem:[#allocation11_spill] sm:$0xff] %v3433_v57 }
  0x21   : > { %4914 = vst [vmem:[#allocation12_spill] sm:$0xff] %v3445_v19 }
  0x22   : > { %2538 = vrot.lane.b32.xlu1 %v3327_v24, %s3175_s29  ;;  %v589_v24 = vsel %vm571_vm0, %v587_v62, %v588_v63  ;;  %v3465_v62 = vpack.i.bf16 %v638_v12, %v580_v11  ;;  %v592_v11 = vsel %vm571_vm0, %v590_v52, %v591_v53  ;;  %v642_v12 = vsel %vm571_vm0, %v591_v53, 0.0 }
  0x23   : > { %2533 = vrot.lane.b32.xlu0 %v3332_v25, %s3175_s29  ;;  %v602_v25 = vrot.slane %v3363_v34, 1 }
  0x26   : > { %2548 = vrot.lane.b32.xlu1 %v3350_v30, %s3175_s29 }
  0x27   : > { %2543 = vrot.lane.b32.xlu0 %v2542_v31, %s3175_s29  ;;  %v583_v31 = vsel %vm571_vm0, %v581_v55, %v582_v56  ;;  %v593_v55 = vrot.slane %v3312_v20, 1  ;;  %v594_v56 = vrot.slane %v3315_v21, 1 }
  0x28   : > { %v3467_v63 = vpack.i.bf16 %v639_v46, %v583_v31 }
  0x29   : > { %v595_v31 = vsel %vm571_vm0, %v593_v55, %v594_v56  ;;  %v643_v46 = vsel %vm571_vm0, %v594_v56, 0.0  ;;  %v3501_v55 = vpack.i.bf16 %v642_v12, %v592_v11  ;;  %v608_v56 = vrot.slane %v3386_v40, 1 }
  0x2a   : > { %2558 = vrot.lane.b32.xlu1 %v3372_v36, %s3175_s29  ;;  %4915 = vst [vmem:[#allocation13_spill] sm:$0xff] %v3467_v63  ;;  %v640_v36 = vsel %vm571_vm0, %v585_v51, 0.0 }
  0x2b   : > { %2553 = vrot.lane.b32.xlu0 %v3377_v37, %s3175_s29  ;;  %v3475_v37 = vpack.i.bf16 %v641_v58, %v589_v24  ;;  %v3489_v24 = vld [vmem:[%s3241_s25 + $0xf8] sm:$0xff]  ;;  %v606_v58 = vrot.slane %v3360_v33, 1 }
  0x2e   : > { %2568 = vrot.lane.b32.xlu1 %v3395_v42, %s3175_s29  ;;  %v476_v42 = vrot.slane %v3299_v17, 7 }
  0x2f   : > { %2563 = vrot.lane.b32.xlu0 %v3401_v43, %s3175_s29  ;;  %v586_v43 = vsel %vm571_vm0, %v584_v47, %v585_v51  ;;  %v605_v47 = vrot.slane %v3357_v32, 1  ;;  %v645_v51 = vsel %vm571_vm0, %v600_v61, 0.0 }
  0x31   : > { %v607_v11 = vsel %vm571_vm0, %v605_v47, %v606_v58 }
  0x32   : > { %2578 = vrot.lane.b32.xlu1 %v3425_v54, %s3175_s29  ;;  %v597_v54 = vrot.slane %v3344_v29, 1 }
  0x33   : > { %2573 = vrot.lane.b32.xlu0 %v3433_v57, %s3175_s29  ;;  %v603_v57 = vrot.slane %v3366_v35, 1 }
  0x34   : > { %v644_v17 = vsel %vm571_vm0, %v597_v54, 0.0 }
  0x35   : > { %v604_v52 = vsel %vm571_vm0, %v602_v25, %v603_v57  ;;  %v646_v53 = vsel %vm571_vm0, %v603_v57, 0.0  ;;  %v654_v25 = vrot.slane %v3486_v18, 7  ;;  %v655_v57 = vrot.slane %v3489_v24, 7 }
  0x36   : > { %2588 = vrot.lane.b32.xlu1 %v3445_v19, %s3176_s30  ;;  %v598_v19 = vsel %vm571_vm0, %v596_v59, %v597_v54  ;;  %v3499_v54 = vpack.i.bf16 %v640_v36, %v586_v43  ;;  %v609_v59 = vrot.slane %v3389_v41, 1  ;;  %v3513_v30 = vpack.i.bf16 %v646_v53, %v604_v52 }
  0x37   : > { %2583 = vrot.lane.b32.xlu0 %v2582_v50, %s3176_s30  ;;  %v601_v50 = vsel %vm571_vm0, %v599_v60, %v600_v61  ;;  %v3505_v60 = vpack.i.bf16 %v643_v46, %v595_v31  ;;  %v3507_v61 = vpack.i.bf16 %v644_v17, %v598_v19  ;;  %v611_v36 = vrot.slane %v3380_v38, 1 }
  0x38   : > { %v612_v43 = vrot.slane %v3383_v39, 1  ;;  %v647_v19 = vsel %vm571_vm0, %v606_v58, 0.0  ;;  %v656_v12 = vsel %vm474_vm1, %v654_v25, %v655_v57  ;;  %v658_v31 = vsel %vm474_vm1, 0.0, %v654_v25 }
  0x39   : > { %4916 = vst [vmem:[#allocation14_spill] sm:$0xff] %v3507_v61  ;;  %v610_v46 = vsel %vm571_vm0, %v608_v56, %v609_v59  ;;  %v648_v17 = vsel %vm571_vm0, %v609_v59, 0.0  ;;  %v615_v52 = vrot.slane %v3415_v49, 1  ;;  %v3535_v58 = vpack.i.bf16 %v647_v19, %v607_v11 }
  0x3a   : > { %2598 = vrot.lane.b32.xlu1 %v3467_v63, %s3176_s30  ;;  %v3511_v63 = vpack.i.bf16 %v645_v51, %v601_v50  ;;  %v614_v50 = vrot.slane %v3412_v48, 1  ;;  %v3528_v51 = vpack.i.bf16 %v656_v12, %v658_v31  ;;  %v613_v47 = vsel %vm571_vm0, %v611_v36, %v612_v43 }
  0x3b   : > { %2593 = vrot.lane.b32.xlu0 %v3465_v62, %s3176_s30  ;;  %v649_v53 = vsel %vm571_vm0, %v612_v43, 0.0  ;;  %v3539_v56 = vpack.i.bf16 %v648_v17, %v610_v46  ;;  %v617_v59 = vrot.slane %v3404_v44, 1  ;;  %v618_v25 = vrot.slane %v3407_v45, 1 }
  0x3c   : > { %4917 = vst [vmem:[#allocation15_spill] sm:$0xff] %v3511_v63  ;;  %4918 = vst [vmem:[#allocation16_spill] sm:$0xff] %v3528_v51  ;;  %v3543_v57 = vpack.i.bf16 %v649_v53, %v613_v47  ;;  %v616_v36 = vsel %vm571_vm0, %v614_v50, %v615_v52  ;;  %v4867_v43 = vrot.slane %v3297_v16, 7  ;;  %v650_v12 = vsel %vm571_vm0, %v615_v52, 0.0 }
  0x3d   : > { %v481_v11 = vrot.slane %v3244_v0, 7  ;;  %v619_v31 = vsel %vm571_vm0, %v617_v59, %v618_v25  ;;  %v651_v46 = vsel %vm571_vm0, %v618_v25, 0.0  ;;  %v482_v17 = vrot.slane %v3247_v1, 7 }
  0x3e   : > { %2608 = vrot.lane.b32.xlu1 %v3475_v37, %s3176_s30  ;;  %v3554_v19 = vsel %vm474_vm1, %v4867_v43, %v476_v42  ;;  %v478_v50 = vrot.slane %v3250_v2, 7  ;;  %v479_v0 = vrot.slane %v3261_v4, 7  ;;  %v3569_v42 = vpack.i.bf16 %v650_v12, %v616_v36 }
  0x3f   : > { %2603 = vrot.lane.b32.xlu0 %v3499_v54, %s3176_s30  ;;  %4919 = vst [vmem:[#allocation17_spill] sm:$0xff] %v3554_v19  ;;  %v3571_v52 = vpack.i.bf16 %v651_v46, %v619_v31  ;;  %v3574_v47 = vsel %vm474_vm1, %v481_v11, %v482_v17  ;;  %v3577_v1 = vsel %vm474_vm1, 0.0, %v481_v11  ;;  %v487_v53 = vrot.slane %v3274_v8, 7 }
  0x40   : > { %4920 = vst [vmem:[#allocation18_spill] sm:$0xff] %v3574_v47  ;;  %4921 = vst [vmem:[#allocation19_spill] sm:$0xff] %v3577_v1  ;;  %v3582_v2 = vsel %vm474_vm1, %v478_v50, %v479_v0  ;;  %v3585_v4 = vsel %vm474_vm1, 0.0, %v478_v50  ;;  %v488_v59 = vrot.slane %v3277_v9, 7  ;;  %v484_v25 = vrot.slane %v3264_v5, 7 }
  0x41   : > { %4922 = vst [vmem:[#allocation20_spill] sm:$0xff] %v3582_v2  ;;  %v485_v36 = vrot.slane %v3267_v6, 7  ;;  %v3595_v12 = vpack.i.bf16 %v3574_v47, %v3577_v1  ;;  %v2662_v11 = vpack.i.bf16 %v3582_v2, %v3585_v4  ;;  %v3605_v5 = vsel %vm474_vm1, 0.0, %v487_v53 }
  0x42   : > { %2618 = vrot.lane.b32.xlu1 %v3505_v60, %s3176_s30  ;;  %v3602_v8 = vsel %vm474_vm1, %v487_v53, %v488_v59  ;;  %v493_v6 = vrot.slane %v3318_v22, 7  ;;  %v494_v9 = vrot.slane %v3321_v23, 7  ;;  %v3613_v46 = vsel %vm474_vm1, 0.0, %v484_v25 }
  0x43   : > { %2613 = vrot.lane.b32.xlu0 %v3501_v55, %s3176_s30  ;;  %v3610_v31 = vsel %vm474_vm1, %v484_v25, %v485_v36  ;;  %4924 = vst [vmem:[#allocation22_spill] sm:$0xff] %v3613_v46  ;;  %v490_v17 = vrot.slane %v3292_v14, 7  ;;  %v491_v50 = vrot.slane %v3295_v15, 7  ;;  %v3621_v0 = vpack.i.bf16 %v3602_v8, %v3605_v5 }
  0x44   : > { %4923 = vst [vmem:[#allocation21_spill] sm:$0xff] %v3610_v31  ;;  %v499_v22 = vrot.slane %v3341_v28, 7  ;;  %v3627_v23 = vpack.i.bf16 %v3610_v31, %v3613_v46  ;;  %v3630_v14 = vsel %vm474_vm1, %v493_v6, %v494_v9  ;;  %v3633_v15 = vsel %vm474_vm1, 0.0, %v493_v6 }
  0x45   : > { %v500_v53 = vrot.slane %v3344_v29, 7  ;;  %v3637_v59 = vsel %vm474_vm1, %v490_v17, %v491_v50  ;;  %v3640_v25 = vsel %vm474_vm1, 0.0, %v490_v17  ;;  %v496_v28 = vrot.slane %v3312_v20, 7 }
  0x46   : > { %2628 = vrot.lane.b32.xlu1 %v3511_v63, %s3176_s30  ;;  %v497_v36 = vrot.slane %v3315_v21, 7  ;;  %v3651_v6 = vsel %vm474_vm1, 0.0, %v499_v22  ;;  %v3657_v29 = vpack.i.bf16 %v3637_v59, %v3640_v25  ;;  %v505_v21 = vrot.slane %v3363_v34, 7 }
  0x47   : > { %2623 = vrot.lane.b32.xlu0 %v3507_v61, %s3176_s30  ;;  %4925 = vst [vmem:[#allocation23_spill] sm:$0xff] %v3651_v6  ;;  %v3660_v20 = vsel %vm474_vm1, %v499_v22, %v500_v53  ;;  %v506_v9 = vrot.slane %v3366_v35, 7  ;;  %v3668_v50 = vsel %vm474_vm1, 0.0, %v496_v28  ;;  %v502_v43 = vrot.slane %v3335_v26, 7 }
  0x48   : > { %4926 = vst [vmem:[#allocation24_spill] sm:$0xff] %v3660_v20  ;;  %v3665_v17 = vsel %vm474_vm1, %v496_v28, %v497_v36  ;;  %v503_v46 = vrot.slane %v3338_v27, 7  ;;  %v3676_v22 = vpack.i.bf16 %v3660_v20, %v3651_v6  ;;  %v511_v34 = vrot.slane %v3386_v40, 7 }
  0x49   : > { %v512_v35 = vrot.slane %v3389_v41, 7  ;;  %v3684_v53 = vpack.i.bf16 %v3665_v17, %v3668_v50  ;;  %v3687_v26 = vsel %vm474_vm1, %v505_v21, %v506_v9  ;;  %v3690_v27 = vsel %vm474_vm1, 0.0, %v505_v21 }
  0x4a   : > { %2638 = vrot.lane.b32.xlu1 %v3535_v58, %s3176_s30  ;;  %4927 = vst [vmem:[#allocation25_spill] sm:$0xff] %v3676_v22  ;;  %4928 = vst [vmem:[#allocation26_spill] sm:$0xff] %v3687_v26  ;;  %v3693_v28 = vsel %vm474_vm1, %v502_v43, %v503_v46  ;;  %v3696_v40 = vsel %vm474_vm1, 0.0, %v502_v43  ;;  %v508_v41 = vrot.slane %v3357_v32, 7  ;;  %v509_v36 = vrot.slane %v3360_v33, 7 }
  0x4b   : > { %2633 = vrot.lane.b32.xlu0 %v3513_v30, %s3176_s30  ;;  %4929 = vst [vmem:[#allocation27_spill] sm:$0xff] %v3690_v27  ;;  %4930 = vst [vmem:[#allocation28_spill] sm:$0xff] %v3693_v28  ;;  %v2707_v9 = vpack.i.bf16 %v3687_v26, %v3690_v27  ;;  %v3705_v31 = vsel %vm474_vm1, %v511_v34, %v512_v35  ;;  %v3711_v43 = vpack.i.bf16 %v3693_v28, %v3696_v40 }
  0x4c   : > { %4931 = vst [vmem:[#allocation29_spill] sm:$0xff] %v3696_v40  ;;  %v3714_v32 = vsel %vm474_vm1, 0.0, %v511_v34  ;;  %v517_v33 = vrot.slane %v3412_v48, 7  ;;  %v518_v46 = vrot.slane %v3415_v49, 7  ;;  %v3719_v21 = vsel %vm474_vm1, %v508_v41, %v509_v36 }
  0x4d   : > { %4932 = vst [vmem:[#allocation30_spill] sm:$0xff] %v3711_v43  ;;  %4933 = vst [vmem:[#allocation31_spill] sm:$0xff] %v3719_v21  ;;  %v3722_v35 = vsel %vm474_vm1, 0.0, %v508_v41  ;;  %v514_v27 = vrot.slane %v3380_v38, 7  ;;  %v515_v26 = vrot.slane %v3383_v39, 7  ;;  %v3729_v34 = vpack.i.bf16 %v3705_v31, %v3714_v32 }
  0x4e   : > { %2648 = vrot.lane.b32.xlu1 %v3543_v57, %s3176_s30  ;;  %4934 = vst [vmem:[#allocation32_spill] sm:$0xff] %v3722_v35  ;;  %v2712_v48 = vpack.i.bf16 %v3719_v21, %v3722_v35  ;;  %v3736_v49 = vsel %vm474_vm1, %v517_v33, %v518_v46  ;;  %v3739_v41 = vsel %vm474_vm1, 0.0, %v517_v33  ;;  %v520_v36 = vrot.slane %v3404_v44, 7  ;;  %v4936_v33 = vld [vmem:[#allocation2_spill] sm:$0xff]  ;;  %v4938_v35 = vld [vmem:[#allocation7_spill] sm:$0xff] }
  0x4f   : > { %2643 = vrot.lane.b32.xlu0 %v3539_v56, %s3176_s30  ;;  %v3742_v38 = vsel %vm474_vm1, %v514_v27, %v515_v26  ;;  %v3745_v39 = vsel %vm474_vm1, 0.0, %v514_v27  ;;  %v521_v47 = vrot.slane %v3407_v45, 7  ;;  %v3753_v46 = vpack.i.bf16 %v3736_v49, %v3739_v41 }
  0x50   : > { %v3758_v26 = vpack.i.bf16 %v3742_v38, %v3745_v39  ;;  %v3764_v44 = vsel %vm474_vm1, 0.0, %v520_v36 }
  0x51   : > { %v3761_v27 = vsel %vm474_vm1, %v520_v36, %v521_v47  ;;  %v4935_v47 = vld [vmem:[#allocation5_spill] sm:$0xff]  ;;  %v4937_v36 = vld [vmem:[#allocation12_spill] sm:$0xff] }
  0x52   : > { %2658 = vrot.lane.b32.xlu1 %v3571_v52, %s3176_s30  ;;  %v3772_v45 = vpack.i.bf16 %v3761_v27, %v3764_v44 }
  0x53   : > { %2653 = vrot.lane.b32.xlu0 %v3569_v42, %s3176_s30 }
  0x56   : > { %2668 = vrot.lane.b32.xlu1 %v3595_v12, %s3177_s6 }
  0x57   : > { %2663 = vrot.lane.b32.xlu0 %v2662_v11, %s3177_s6  ;;  %v3648_v11 = vpack.i.bf16 %v3630_v14, %v3633_v15 }
  0x5a   : > { %2678 = vrot.lane.b32.xlu1 %v3621_v0, %s3177_s6 }
  0x5b   : > { %2673 = vrot.lane.b32.xlu0 %v3627_v23, %s3177_s6 }
  0x5e   : > { %2688 = vrot.lane.b32.xlu1 %v3648_v11, %s3177_s6 }
  0x5f   : > { %2683 = vrot.lane.b32.xlu0 %v3657_v29, %s3177_s6 }
  0x62   : > { %2698 = vrot.lane.b32.xlu1 %v3676_v22, %s3177_s6 }
  0x63   : > { %2693 = vrot.lane.b32.xlu0 %v3684_v53, %s3177_s6 }
  0x66   : > { %2708 = vrot.lane.b32.xlu1 %v2707_v9, %s3177_s6 }
  0x67   : > { %2703 = vrot.lane.b32.xlu0 %v3711_v43, %s3177_s6 }
  0x6a   : > { %2718 = vrot.lane.b32.xlu1 %v3729_v34, %s3177_s6 }
  0x6b   : > { %2713 = vrot.lane.b32.xlu0 %v2712_v48, %s3177_s6 }
  0x6e   : > { %2728 = vrot.lane.b32.xlu1 %v3753_v46, %s3177_s6 }
  0x6f   : > { %2723 = vrot.lane.b32.xlu0 %v3758_v26, %s3177_s6 }
  0x72   : > { %2738 = vrot.lane.b32.xlu1 %v3528_v51, %s3177_s6 }
  0x73   : > { %2733 = vrot.lane.b32.xlu0 %v3772_v45, %s3177_s6 }
  0x76   : > { %2748 = vrot.lane.b32.xlu1 %v3258_v3, %s3178_s7 }
  0x77   : > { %2743 = vrot.lane.b32.xlu0 %v3271_v7, %s3178_s7 }
  0x7a   : > { %2758 = vrot.lane.b32.xlu1 %v3289_v13, %s3178_s7 }
  0x7b   : > { %2753 = vrot.lane.b32.xlu0 %v3283_v10, %s3178_s7 }
  0x7e   : > { %2768 = vrot.lane.b32.xlu1 %v4935_v47, %s3178_s7  ;;  %v3142_v47 = vld [vmem:[%s4843_s3] sm:$0xff]  }
  0x7f   : > { %2763 = vrot.lane.b32.xlu0 %v4936_v33, %s3178_s7  ;;  %2423 = vmatprep.subr.bf16.mxu0 %v3142_v47 }
  0x80   : > { %2424 = vmatpush3.bf16.msra.mxu0 %v3142_v47  ;;  %2461 = vmatprep.subr.bf16.mxu1 %v3142_v47 }
  0x81   : > { %2464 = vmatpush3.bf16.msra.mxu1 %v3142_v47 }
  0x82   : > { %2778 = vrot.lane.b32.xlu1 %v4937_v36, %s3179_s8 }
  0x83   : > { %2773 = vrot.lane.b32.xlu0 %v4938_v35, %s3178_s7 }
  0x86   : > { %2788 = vrot.lane.b32.xlu1 %v3465_v62, %s3179_s8 }
  0x87   : > { %2783 = vrot.lane.b32.xlu0 %v3511_v63, %s3179_s8  ;;  %v3144_v63 = vld [vmem:[%s4843_s3 + $0x10] ss:$0 sps:$4 sm:$0x33]  }
  0x88   : > { %v3798_v7 = vpop.permute.xlu1 %2508 }
  0x89   : > { %4939 = vst [vmem:[#allocation5_spill] sm:$0xff] %v3798_v7  ;;  %v3800_v21 = vpop.permute.xlu0 %2503  ;;  %v3143_v7 = vld [vmem:[%s4843_s3 + $0x8] sm:$0xff]  }
  0x8a   : > { %2798 = vrot.lane.b32.xlu1 %v3595_v12, %s3180_s11  ;;  %2425 = vmatprep.subr.bf16.mxu0 %v3143_v7 }
  0x8b   : > { %2793 = vrot.lane.b32.xlu0 %v3513_v30, %s3179_s8  ;;  %2426 = vmatpush3.bf16.msra.mxu0 %v3143_v7 }
  0x8c   : > { %v3809_v36 = vpop.permute.xlu1 %2513  ;;  %2462 = vmatprep.subr.bf16.mxu1 %v3143_v7  ;;  %2467 = vmatprep.subr.msk.bf16.mxu0 %vm1835_vm2, %v3144_v63 }
  0x8d   : > { %4940 = vst [vmem:[#allocation2_spill] sm:$0xff] %v3809_v36  ;;  %v3811_v1 = vpop.permute.xlu0 %2518  ;;  %2465 = vmatpush3.bf16.msra.mxu1 %v3143_v7 }
  0x8e   : > { %2808 = vrot.lane.b32.xlu1 %v3627_v23, %s3180_s11  ;;  %v1837_v23 = vsel %vm1835_vm2, %v3144_v63, 0  ;;  %2468 = vmatprep.subr.msk.bf16.mxu1 %vm1835_vm2, %v3144_v63 }
  0x8f   : > { %2803 = vrot.lane.b32.xlu0 %v2707_v9, %s3180_s11  ;;  %2428 = vmatpush3.bf16.msra.mxu0 %v1837_v23 }
  0x90   : > { %v3819_v12 = vpop.permute.xlu1 %2523 }
  0x91   : > { %v3821_v36 = vpop.permute.xlu0 %2528  ;;  %2466 = vmatpush3.bf16.msra.mxu1 %v1837_v23  ;;  %v2526_v61 = vunpack.i.h.bf16 %v3819_v12 }
  0x92   : > { %2818 = vrot.lane.b32.xlu1 %v3258_v3, %s3181_s16 }
  0x93   : > { %2813 = vrot.lane.b32.xlu0 %v2712_v48, %s3180_s11  ;;  %v4942_v48 = vld [vmem:[#allocation6_spill] sm:$0xff] }
  0x94   : > { %v3829_v9 = vpop.permute.xlu1 %2538 }
  0x95   : > { %v3831_v47 = vpop.permute.xlu0 %2533 }
  0x96   : > { %2828 = vrot.lane.b32.xlu1 %v3283_v10, %s3181_s16  ;;  %v4945_v10 = vld [vmem:[#allocation13_spill] sm:$0xff] }
  0x97   : > { %2823 = vrot.lane.b32.xlu0 %v4938_v35, %s3181_s16 }
  0x98   : > { %v3837_v7 = vpop.permute.xlu1 %2548 }
  0x99   : > { %v3839_v3 = vpop.permute.xlu0 %2543 }
  0x9a   : > { %4941 = vst [vmem:[#allocation12_spill] sm:$0xff] %v3839_v3  ;;  %2838 = vrot.lane.b32.xlu1 %v3465_v62, %s3182_s17 }
  0x9b   : > { %2833 = vrot.lane.b32.xlu0 %v4942_v48, %s3181_s16 }
  0x9c   : > { %v3845_v63 = vpop.permute.xlu1 %2558 }
  0x9d   : > { %4943 = vst [vmem:[#allocation7_spill] sm:$0xff] %v3845_v63  ;;  %v3847_v23 = vpop.permute.xlu0 %2553 }
  0x9e   : > { %4944 = vst [vmem:[#allocation6_spill] sm:$0xff] %v3847_v23  ;;  %2848 = vrot.lane.b32.xlu1 %v4945_v10, %s3182_s17  ;;  %v4946_v23 = vld [vmem:[#allocation9_spill] sm:$0xff] }
  0x9f   : > { %2843 = vrot.lane.b32.xlu0 %v3513_v30, %s3182_s17 }
  0xa0   : > { %v3853_v35 = vpop.permute.xlu1 %2568 }
  0xa1   : > { %v3855_v43 = vpop.permute.xlu0 %2563 }
  0xa2   : > { %2858 = vrot.lane.b32.xlu1 %v4942_v48, %s3178_s7 }
  0xa3   : > { %2853 = vrot.lane.b32.xlu0 %v3535_v58, %s3182_s17 }
  0xa4   : > { %v3861_v62 = vpop.permute.xlu1 %2578 }
  0xa5   : > { %v3863_v63 = vpop.permute.xlu0 %2573 }
  0xa6   : > { %2868 = vrot.lane.b32.xlu1 %v4945_v10, %s3179_s8 }
  0xa7   : > { %2863 = vrot.lane.b32.xlu0 %v4946_v23, %s3178_s7 }
  0xa8   : > { %v3869_v30 = vpop.permute.xlu1 %2588 }
  0xa9   : > { %4947 = vst [vmem:[#allocation13_spill] sm:$0xff] %v3869_v30  ;;  %v3871_v22 = vpop.permute.xlu0 %2583 }
  0xaa   : > { %4948 = vst [vmem:[#allocation9_spill] sm:$0xff] %v3871_v22  ;;  %2878 = vrot.lane.b32.xlu1 %v3499_v54, %s3179_s8 }
  0xab   : > { %2873 = vrot.lane.b32.xlu0 %v3535_v58, %s3179_s8 }
  0xac   : > { %v3877_v48 = vpop.permute.xlu1 %2598 }
  0xad   : > { %4949 = vst [vmem:[#allocation33_spill] sm:$0xff] %v3877_v48  ;;  %v3879_v51 = vpop.permute.xlu0 %2593 }
  0xae   : > { %4950 = vst [vmem:[#allocation34_spill] sm:$0xff] %v3879_v51  ;;  %2888 = vrot.lane.b32.xlu1 %v3621_v0, %s3180_s11 }
  0xaf   : > { %2883 = vrot.lane.b32.xlu0 %v3539_v56, %s3179_s8 }
  0xb0   : > { %v2609_v10 = vpop.permute.xlu1 %2608 }
  0xb1   : > { %v2604_v6 = vpop.permute.xlu0 %2603  ;;  %v2611_v40 = vunpack.i.h.bf16 %v2609_v10 }
  0xb2   : > { %2898 = vrot.lane.b32.xlu1 %v3657_v29, %s3180_s11  ;;  %v2606_v22 = vunpack.i.h.bf16 %v2604_v6  ;;  %v2605_v28 = vunpack.i.l.bf16 %v2604_v6  ;;  %v2540_v6 = vunpack.i.l.bf16 %v3829_v9 }
  0xb3   : > { %2893 = vrot.lane.b32.xlu0 %v3729_v34, %s3180_s11 }
  0xb4   : > { %v3889_v20 = vpop.permute.xlu1 %2618 }
  0xb5   : > { %v3891_v58 = vpop.permute.xlu0 %2613 }
  0xb6   : > { %2908 = vrot.lane.b32.xlu1 %v3289_v13, %s3181_s16  ;;  %v4955_v13 = vld [vmem:[#allocation8_spill] sm:$0xff] }
  0xb7   : > { %2903 = vrot.lane.b32.xlu0 %v3758_v26, %s3180_s11 }
  0xb8   : > { %v3897_v0 = vpop.permute.xlu1 %2628 }
  0xb9   : > { %4951 = vst [vmem:[#allocation35_spill] sm:$0xff] %v3897_v0  ;;  %v3899_v51 = vpop.permute.xlu0 %2623  ;;  %v2525_v0 = vunpack.i.l.bf16 %v3819_v12  ;;  %v1491_v12 = vsel %vm1479_vm3, %v3637_v59, %v2526_v61 }
  0xba   : > { %4952 = vst [vmem:[#allocation36_spill] sm:$0xff] %v3899_v51  ;;  %2918 = vrot.lane.b32.xlu1 %v4936_v33, %s3181_s16  ;;  %v2520_v51 = vunpack.i.l.bf16 %v3811_v1 }
  0xbb   : > { %2913 = vrot.lane.b32.xlu0 %v4946_v23, %s3181_s16 }
  0xbc   : > { %v3905_v29 = vpop.permute.xlu1 %2638  ;;  %v1488_v30 = vsel %vm1479_vm3, %v3605_v5, %v2520_v51  ;;  %v2535_v51 = vunpack.i.l.bf16 %v3831_v47  ;;  %v1524_v5 = vsel %vm1512_vm4, %v1491_v12, %v2611_v40  ;;  %v2616_v40 = vunpack.i.h.bf16 %v3891_v58 }
  0xbd   : > { %4953 = vst [vmem:[#allocation37_spill] sm:$0xff] %v3905_v29  ;;  %v3907_v34 = vpop.permute.xlu0 %2633  ;;  %v2521_v29 = vunpack.i.h.bf16 %v3811_v1  ;;  %v1521_v61 = vsel %vm1512_vm4, %v1488_v30, %v2605_v28 }
  0xbe   : > { %4954 = vst [vmem:[#allocation38_spill] sm:$0xff] %v3907_v34  ;;  %2928 = vrot.lane.b32.xlu1 %v3499_v54, %s3182_s17  ;;  %v1492_v12 = vsel %vm1479_vm3, %v3633_v15, %v2535_v51 }
  0xbf   : > { %2923 = vrot.lane.b32.xlu0 %v4955_v13, %s3181_s16  ;;  %v1489_v19 = vsel %vm1479_vm3, %v3602_v8, %v2521_v29  ;;  %v2536_v8 = vunpack.i.h.bf16 %v3831_v47  ;;  %v2615_v47 = vunpack.i.l.bf16 %v3891_v58 }
  0xc0   : > { %v3913_v26 = vpop.permute.xlu1 %2648  ;;  %v1522_v59 = vsel %vm1512_vm4, %v1489_v19, %v2606_v22  ;;  %v1494_v22 = vsel %vm1479_vm3, %v3668_v50, %v2540_v6 }
  0xc1   : > { %v3915_v48 = vpop.permute.xlu0 %2643 }
  0xc2   : > { %2938 = vrot.lane.b32.xlu1 %v3475_v37, %s3182_s17 }
  0xc3   : > { %2933 = vrot.lane.b32.xlu0 %v3539_v56, %s3182_s17  ;;  %v4958_v56 = vld [vmem:[#allocation11_spill] sm:$0xff] }
  0xc4   : > { %v3921_v33 = vpop.permute.xlu1 %2658 }
  0xc5   : > { %v3923_v23 = vpop.permute.xlu0 %2653 }
  0xc6   : > { %2948 = vrot.lane.b32.xlu1 %v4955_v13, %s3178_s7  ;;  %v4959_v13 = vld [vmem:[#allocation4_spill] sm:$0xff] }
  0xc7   : > { %2943 = vrot.lane.b32.xlu0 %v3543_v57, %s3182_s17 }
  0xc8   : > { %v3929_v54 = vpop.permute.xlu1 %2668 }
  0xc9   : > { %4956 = vst [vmem:[#allocation8_spill] sm:$0xff] %v3929_v54  ;;  %v3931_v34 = vpop.permute.xlu0 %2663  ;;  %v2610_v54 = vunpack.i.l.bf16 %v2609_v10  ;;  %v1490_v10 = vsel %vm1479_vm3, %v3640_v25, %v2525_v0 }
  0xca   : > { %4957 = vst [vmem:[#allocation39_spill] sm:$0xff] %v3931_v34  ;;  %2958 = vrot.lane.b32.xlu1 %v4958_v56, %s3178_s7 }
  0xcb   : > { %2953 = vrot.lane.b32.xlu0 %v4959_v13, %s3178_s7 }
  0xcc   : > { %v3941_v34 = vpop.permute.xlu1 %2678 }
  0xcd   : > { %4960 = vst [vmem:[#allocation11_spill] sm:$0xff] %v3941_v34  ;;  %v3943_v1 = vpop.permute.xlu0 %2673  ;;  %v2541_v34 = vunpack.i.h.bf16 %v3829_v9  ;;  %v2621_v9 = vunpack.i.h.bf16 %v3889_v20 }
  0xce   : > { %4961 = vst [vmem:[#allocation4_spill] sm:$0xff] %v3943_v1  ;;  %2968 = vrot.lane.b32.xlu1 %v3543_v57, %s3179_s8  ;;  %v1523_v57 = vsel %vm1512_vm4, %v1490_v10, %v2610_v54 }
  0xcf   : > { %2963 = vrot.lane.b32.xlu0 %v3475_v37, %s3179_s8  ;;  %v2620_v37 = vunpack.i.l.bf16 %v3889_v20  ;;  %v1495_v20 = vsel %vm1479_vm3, %v3665_v17, %v2541_v34 }
  0xd0   : > { %v2689_v29 = vpop.permute.xlu1 %2688  ;;  %v1528_v17 = vsel %vm1512_vm4, %v1495_v20, %v2621_v9  ;;  %v2650_v9 = vunpack.i.l.bf16 %v3913_v26  ;;  %v2581_v20 = vunpack.i.h.bf16 %v3861_v62 }
  0xd1   : > { %v2691_v25 = vunpack.i.h.bf16 %v2689_v29  ;;  %v2690_v0 = vunpack.i.l.bf16 %v2689_v29  ;;  %v2684_v1 = vpop.permute.xlu0 %2683  ;;  %v1527_v50 = vsel %vm1512_vm4, %v1494_v22, %v2620_v37 }
  0xd2   : > { %v2686_v3 = vunpack.i.h.bf16 %v2684_v1  ;;  %v2685_v2 = vunpack.i.l.bf16 %v2684_v1  ;;  %2978 = vrot.lane.b32.xlu1 %v3569_v42, %s3179_s8  ;;  %v1493_v1 = vsel %vm1479_vm3, %v3630_v14, %v2536_v8 }
  0xd3   : > { %v3972_v28 = vsel %vm1545_vm5, %v1523_v57, %v2690_v0  ;;  %v3975_v19 = vsel %vm1545_vm5, %v1524_v5, %v2691_v25  ;;  %2973 = vrot.lane.b32.xlu0 %v3501_v55, %s3179_s8  ;;  %v1526_v6 = vsel %vm1512_vm4, %v1493_v1, %v2616_v40  ;;  %v2566_v25 = vunpack.i.h.bf16 %v3855_v43 }
  0xd4   : > { %4962 = vst [vmem:[#allocation40_spill] sm:$0xff] %v3972_v28  ;;  %v3984_v30 = vsel %vm1545_vm5, %v1522_v59, %v2686_v3  ;;  %v3987_v58 = vsel %vm1545_vm5, %v1521_v61, %v2685_v2  ;;  %v2699_v54 = vpop.permute.xlu1 %2698  ;;  %v1525_v2 = vsel %vm1512_vm4, %v1492_v12, %v2615_v47  ;;  %v2571_v61 = vunpack.i.h.bf16 %v3853_v35  ;;  %v4989_v28 = vld [vmem:[#allocation25_spill] sm:$0xff] }
  0xd5   : > { %v2701_v10 = vunpack.i.h.bf16 %v2699_v54  ;;  %v2700_v5 = vunpack.i.l.bf16 %v2699_v54  ;;  %v2694_v57 = vpop.permute.xlu0 %2693  ;;  %v2570_v59 = vunpack.i.l.bf16 %v3853_v35  ;;  %v2651_v0 = vunpack.i.h.bf16 %v3913_v26 }
  0xd6   : > { %v2696_v34 = vunpack.i.h.bf16 %v2694_v57  ;;  %v2695_v3 = vunpack.i.l.bf16 %v2694_v57  ;;  %2988 = vrot.lane.b32.xlu1 %v3753_v46, %s3180_s11  ;;  %v2646_v40 = vunpack.i.h.bf16 %v3915_v48  ;;  %v2645_v35 = vunpack.i.l.bf16 %v3915_v48 }
  0xd7   : > { %v4000_v14 = vsel %vm1545_vm5, %v1527_v50, %v2700_v5  ;;  %v4003_v15 = vsel %vm1545_vm5, %v1528_v17, %v2701_v10  ;;  %2983 = vrot.lane.b32.xlu0 %v3648_v11, %s3180_s11  ;;  %v2565_v11 = vunpack.i.l.bf16 %v3855_v43  ;;  %v1506_v43 = vsel %vm1479_vm3, %v3745_v39, %v2570_v59 }
  0xd8   : > { %4963 = vst [vmem:[#allocation41_spill] sm:$0xff] %v4000_v14  ;;  %4964 = vst [vmem:[#allocation42_spill] sm:$0xff] %v4003_v15  ;;  %v4008_v8 = vsel %vm1545_vm5, %v1526_v6, %v2696_v34  ;;  %v4011_v51 = vsel %vm1545_vm5, %v1525_v2, %v2695_v3  ;;  %v4013_v46 = vpop.permute.xlu1 %2708  ;;  %v2580_v48 = vunpack.i.l.bf16 %v3861_v62  ;;  %v2575_v39 = vunpack.i.l.bf16 %v3863_v63  ;;  %v4968_v2 = vld [vmem:[#allocation3_spill] sm:$0xff]  ;;  %v4985_v15 = vld [vmem:[#allocation36_spill] sm:$0xff] }
  0xd9   : > { %4965 = vst [vmem:[#allocation43_spill] sm:$0xff] %v4008_v8  ;;  %4966 = vst [vmem:[#allocation44_spill] sm:$0xff] %v4011_v51  ;;  %v4015_v29 = vpop.permute.xlu0 %2703  ;;  %v1504_v26 = vsel %vm1479_vm3, %v3714_v32, %v2565_v11  ;;  %v2661_v10 = vunpack.i.h.bf16 %v3921_v33  ;;  %v2656_v17 = vunpack.i.h.bf16 %v3923_v23  ;;  %v2655_v50 = vunpack.i.l.bf16 %v3923_v23  ;;  %v4987_v8 = vld [vmem:[#allocation39_spill] sm:$0xff] }
  0xda   : > { %2998 = vrot.lane.b32.xlu1 %v3772_v45, %s3180_s11  ;;  %v1507_v45 = vsel %vm1479_vm3, %v3742_v38, %v2571_v61  ;;  %v2576_v38 = vunpack.i.h.bf16 %v3863_v63  ;;  %v4967_v63 = vld [vmem:[#allocation10_spill] sm:$0xff]  ;;  %v1510_v6 = vsel %vm1479_vm3, %v3764_v44, %v2580_v48  ;;  %v1508_v11 = vsel %vm1479_vm3, %v3739_v41, %v2575_v39 }
  0xdb   : > { %2993 = vrot.lane.b32.xlu0 %v3684_v53, %s3180_s11  ;;  %v1505_v53 = vsel %vm1479_vm3, %v3705_v31, %v2566_v25  ;;  %v1540_v22 = vsel %vm1512_vm4, %v1507_v45, %v2651_v0  ;;  %v1537_v31 = vsel %vm1512_vm4, %v1504_v26, %v2645_v35  ;;  %v2666_v51 = vunpack.i.h.bf16 %v4987_v8 }
  0xdc   : > { %v4027_v37 = vpop.permute.xlu1 %2718  ;;  %v1538_v32 = vsel %vm1512_vm4, %v1505_v53, %v2646_v40  ;;  %v1509_v25 = vsel %vm1479_vm3, %v3736_v49, %v2576_v38  ;;  %v435_v53 = vld [vmem:[%s377_s26 + $0x8] sm:$0xff]  ;;  %v1541_v49 = vsel %vm1512_vm4, %v1508_v11, %v2655_v50 }
  0xdd   : > { %v4031_v47 = vpop.permute.xlu0 %2713  ;;  %v1542_v41 = vsel %vm1512_vm4, %v1509_v25, %v2656_v17  ;;  %v3148_v17 = vld [vmem:[%s3241_s25 + $0x78] sm:$0xff] }
  0xde   : > { %3008 = vrot.lane.b32.xlu1 %v4958_v56, %s3181_s16  ;;  %v1539_v56 = vsel %vm1512_vm4, %v1506_v43, %v2650_v9  ;;  %v434_v43 = vld [vmem:[%s377_s26] sm:$0xff] }
  0xdf   : > { %3003 = vrot.lane.b32.xlu0 %v4959_v13, %s3181_s16  ;;  %v2660_v13 = vunpack.i.l.bf16 %v3921_v33  ;;  %v1511_v33 = vsel %vm1479_vm3, %v3761_v27, %v2581_v20 }
  0xe0   : > { %v2729_v54 = vpop.permute.xlu1 %2728  ;;  %v1544_v27 = vsel %vm1512_vm4, %v1511_v33, %v2661_v10 }
  0xe1   : > { %v2731_v1 = vunpack.i.h.bf16 %v2729_v54  ;;  %v2730_v12 = vunpack.i.l.bf16 %v2729_v54  ;;  %v2724_v62 = vpop.permute.xlu0 %2723  ;;  %v1543_v44 = vsel %vm1512_vm4, %v1510_v6, %v2660_v13  ;;  %v3146_v54 = vld [vmem:[%s3241_s25 + $0x68] sm:$0xff] }
  0xe2   : > { %v2726_v5 = vunpack.i.h.bf16 %v2724_v62  ;;  %v2725_v57 = vunpack.i.l.bf16 %v2724_v62  ;;  %3018 = vrot.lane.b32.xlu1 %v4967_v63, %s3181_s16 }
  0xe3   : > { %v4061_v34 = vsel %vm1545_vm5, %v1539_v56, %v2730_v12  ;;  %v4064_v3 = vsel %vm1545_vm5, %v1540_v22, %v2731_v1  ;;  %3013 = vrot.lane.b32.xlu0 %v4968_v2, %s3181_s16  ;;  %v4109_v22 = vmul.f32 0.0, %v434_v43  ;;  %v4111_v56 = vmul.f32 0.0, %v435_v53  ;;  %v4981_v43 = vld [vmem:[#allocation35_spill] sm:$0xff] }
  0xe4   : > { %v4076_v23 = vsel %vm1545_vm5, %v1538_v32, %v2726_v5  ;;  %v4079_v61 = vsel %vm1545_vm5, %v1537_v31, %v2725_v57  ;;  %v2739_v59 = vpop.permute.xlu1 %2738  ;;  %v659_v1 = vrot.slane %v3486_v18, 1  ;;  %v660_v12 = vrot.slane %v3489_v24, 1  ;;  %v3147_v57 = vld [vmem:[%s3241_s25 + $0x70] sm:$0xff] }
  0xe5   : > { %v2741_v0 = vunpack.i.h.bf16 %v2739_v59  ;;  %v2740_v9 = vunpack.i.l.bf16 %v2739_v59  ;;  %v2734_v40 = vpop.permute.xlu0 %2733  ;;  %v666_v10 = vrot.slane %v4109_v22, 7  ;;  %v667_v13 = vrot.slane %v4111_v56, 7 }
  0xe6   : > { %v2736_v35 = vunpack.i.h.bf16 %v2734_v40  ;;  %v2735_v45 = vunpack.i.l.bf16 %v2734_v40  ;;  %3028 = vrot.lane.b32.xlu1 %v3569_v42, %s3182_s17  ;;  %v4131_v5 = vpack.i.bf16 %v3489_v24, %v3486_v18  ;;  %v4136_v50 = vpack.i.bf16 %v3148_v17, %v3147_v57 }
  0xe7   : > { %v4092_v26 = vsel %vm1545_vm5, %v1543_v44, %v2740_v9  ;;  %v4095_v20 = vsel %vm1545_vm5, %v1544_v27, %v2741_v0  ;;  %3023 = vrot.lane.b32.xlu0 %v3501_v55, %s3182_s17  ;;  %v3145_v55 = vld [vmem:[%s3241_s25 + $0x60] sm:$0xff]  ;;  %v661_v33 = vsel %vm571_vm0, %v659_v1, %v660_v12  ;;  %v663_v6 = vsel %vm571_vm0, %v660_v12, 0.0  ;;  %v4980_v12 = vld [vmem:[#allocation29_spill] sm:$0xff] }
  0xe8   : > { %4969 = vst [vmem:[#allocation10_spill] sm:$0xff] %v4092_v26  ;;  %4970 = vst [vmem:[#allocation3_spill] sm:$0xff] %v4095_v20  ;;  %v4100_v48 = vsel %vm1545_vm5, %v1542_v41, %v2736_v35  ;;  %v4103_v42 = vsel %vm1545_vm5, %v1541_v49, %v2735_v45  ;;  %v4105_v38 = vpop.permute.xlu1 %2748  ;;  %v3042_v31 = vpack.i.bf16 %v3146_v54, %v3145_v55  ;;  %v4148_v18 = vsel %vm474_vm1, 0.0, %v666_v10  ;;  %v4974_v54 = vld [vmem:[#allocation20_spill] sm:$0xff] }
  0xe9   : > { %4971 = vst [vmem:[#allocation45_spill] sm:$0xff] %v4100_v48  ;;  %4972 = vst [vmem:[#allocation46_spill] sm:$0xff] %v4103_v42  ;;  %v4107_v39 = vpop.permute.xlu0 %2743  ;;  %v4973_v24 = vrot.slane %v3297_v16, 7  ;;  %v671_v11 = vrot.slane %v4109_v22, 1  ;;  %v672_v0 = vrot.slane %v4111_v56, 1  ;;  %v2506_v9 = vunpack.i.h.bf16 %v3800_v21 }
  0xea   : > { %3038 = vrot.lane.b32.xlu1 %v3571_v52, %s3182_s17  ;;  %v2505_v40 = vunpack.i.l.bf16 %v3800_v21  ;;  %v4161_v27 = vpack.i.bf16 %v663_v6, %v661_v33  ;;  %v2531_v35 = vunpack.i.h.bf16 %v3821_v36  ;;  %v2530_v21 = vunpack.i.l.bf16 %v3821_v36  ;;  %v4190_v36 = vld [vmem:[%s3241_s25 + $0x80] sm:$0xff]  ;;  %v4977_v6 = vld [vmem:[#allocation17_spill] sm:$0xff] }
  0xeb   : > { %3033 = vrot.lane.b32.xlu0 %v3505_v60, %s3182_s17  ;;  %v555_v25 = vsel %vm474_vm1, 0.0, %v4973_v24  ;;  %v2551_v53 = vunpack.i.h.bf16 %v3837_v7  ;;  %v4177_v49 = vsel %vm571_vm0, %v671_v11, %v672_v0  ;;  %v4180_v41 = vsel %vm571_vm0, %v672_v0, 0.0  ;;  %v4978_v0 = vld [vmem:[#allocation28_spill] sm:$0xff] }
  0xec   : > { %v4119_v32 = vpop.permute.xlu1 %2758  ;;  %v1482_v55 = vsel %vm1479_vm3, %v3585_v4, %v2505_v40  ;;  %v2550_v1 = vunpack.i.l.bf16 %v3837_v7  ;;  %v4976_v4 = vld [vmem:[#allocation13_spill] sm:$0xff]  ;;  %v1481_v7 = vsel %vm1479_vm3, %v4977_v6, %v2531_v35  ;;  %v1480_v11 = vsel %vm1479_vm3, %v555_v25, %v2530_v21  ;;  %v4982_v25 = vld [vmem:[#allocation14_spill] sm:$0xff]  ;;  %v4983_v21 = vld [vmem:[#allocation24_spill] sm:$0xff] }
  0xed   : > { %v4123_v62 = vpop.permute.xlu0 %2753  ;;  %v2590_v17 = vunpack.i.l.bf16 %v4976_v4  ;;  %v4979_v40 = vld [vmem:[#allocation9_spill] sm:$0xff]  ;;  %v2631_v44 = vunpack.i.h.bf16 %v4981_v43  ;;  %v2630_v24 = vunpack.i.l.bf16 %v4981_v43  ;;  %v2625_v20 = vunpack.i.l.bf16 %v4985_v15 }
  0xee   : > { %3048 = vrot.lane.b32.xlu1 %v4967_v63, %s3178_s7  ;;  %v4145_v63 = vsel %vm474_vm1, %v666_v10, %v667_v13  ;;  %v4975_v10 = vld [vmem:[#allocation12_spill] sm:$0xff]  ;;  %v1498_v35 = vsel %vm1479_vm3, %v4980_v12, %v2550_v1  ;;  %v2586_v6 = vunpack.i.h.bf16 %v4979_v40  ;;  %v2626_v12 = vunpack.i.h.bf16 %v4985_v15 }
  0xef   : > { %3043 = vrot.lane.b32.xlu0 %v3042_v31, %s3178_s7  ;;  %v1483_v31 = vsel %vm1479_vm3, %v4974_v54, %v2506_v9  ;;  %v2546_v13 = vunpack.i.h.bf16 %v4975_v10  ;;  %v2545_v57 = vunpack.i.l.bf16 %v4975_v10  ;;  %v1499_v9 = vsel %vm1479_vm3, %v4978_v0, %v2551_v53  ;;  %v4984_v0 = vld [vmem:[#allocation23_spill] sm:$0xff] }
  0xf0   : > { %v4138_v2 = vpop.permute.xlu1 %2768  ;;  %v2585_v54 = vunpack.i.l.bf16 %v4979_v40  ;;  %v2591_v10 = vunpack.i.h.bf16 %v4976_v4  ;;  %v1515_v14 = vsel %vm1512_vm4, %v1482_v55, %v2590_v17  ;;  %v4986_v40 = vld [vmem:[#allocation8_spill] sm:$0xff]  ;;  %v2665_v55 = vunpack.i.l.bf16 %v4987_v8 }
  0xf1   : > { %v4142_v59 = vpop.permute.xlu0 %2763  ;;  %v1497_v53 = vsel %vm1479_vm3, %v4983_v21, %v2546_v13  ;;  %v1496_v4 = vsel %vm1479_vm3, %v4984_v0, %v2545_v57  ;;  %v2671_v26 = vunpack.i.h.bf16 %v4986_v40  ;;  %v2670_v43 = vunpack.i.l.bf16 %v4986_v40  ;;  %v4988_v21 = vld [vmem:[#allocation16_spill] sm:$0xff] }
  0xf2   : > { %3058 = vrot.lane.b32.xlu1 %v4131_v5, %s3178_s7  ;;  %v1513_v13 = vsel %vm1512_vm4, %v1480_v11, %v2585_v54  ;;  %v1516_v57 = vsel %vm1512_vm4, %v1483_v31, %v2591_v10  ;;  %v2710_v17 = vunpack.i.l.bf16 %v4013_v46  ;;  %v1514_v15 = vsel %vm1512_vm4, %v1481_v7, %v2586_v6 }
  0xf3   : > { %3053 = vrot.lane.b32.xlu0 %v4136_v50, %s3178_s7  ;;  %v1532_v0 = vsel %vm1512_vm4, %v1499_v9, %v2631_v44  ;;  %v1531_v40 = vsel %vm1512_vm4, %v1498_v35, %v2630_v24  ;;  %v2711_v42 = vunpack.i.h.bf16 %v4013_v46  ;;  %v1529_v31 = vsel %vm1512_vm4, %v1496_v4, %v2625_v20  ;;  %v4991_v4 = vld [vmem:[#allocation30_spill] sm:$0xff] }
  0xf4   : > { %v4163_v16 = vpop.permute.xlu1 %2778  ;;  %v2706_v8 = vunpack.i.h.bf16 %v4015_v29  ;;  %v2705_v11 = vunpack.i.l.bf16 %v4015_v29  ;;  %v2750_v54 = vunpack.i.l.bf16 %v4105_v38  ;;  %v1530_v7 = vsel %vm1512_vm4, %v1497_v53, %v2626_v12 }
  0xf5   : > { %v4168_v45 = vpop.permute.xlu0 %2773  ;;  %v1548_v44 = vsel %vm1545_vm5, %v1515_v14, %v2670_v43  ;;  %v1549_v24 = vsel %vm1545_vm5, %v1516_v57, %v2671_v26  ;;  %v1547_v46 = vsel %vm1545_vm5, %v1514_v15, %v2666_v51  ;;  %v1546_v20 = vsel %vm1545_vm5, %v1513_v13, %v2665_v55 }
  0xf6   : > { %3068 = vrot.lane.b32.xlu1 %v3571_v52, %s3179_s8  ;;  %v4193_v52 = vld [vmem:[%s3241_s25 + $0x88] sm:$0xff]  ;;  %v4262_v9 = vsel %vm1545_vm5, %v1531_v40, %v2710_v17  ;;  %v2751_v29 = vunpack.i.h.bf16 %v4105_v38  ;;  %v2745_v35 = vunpack.i.l.bf16 %v4107_v39  ;;  %v4990_v14 = vpack.i.bf16 %v4145_v63, %v4148_v18  ;;  %s2402_s25 = sshll.u32 %s5028_s18, 9  ;;  %s3183_s18 = smov 120  }
  0xf7   : > { %3063 = vrot.lane.b32.xlu0 %v3505_v60, %s3179_s8  ;;  %v1565_v26 = vsel %vm1545_vm5, %v1532_v0, %v2711_v42  ;;  %v2746_v51 = vunpack.i.h.bf16 %v4107_v39  ;;  %v2771_v6 = vunpack.i.h.bf16 %v4138_v2  ;;  %v2770_v53 = vunpack.i.l.bf16 %v4138_v2  ;;  %s4637_s6 = scalar_lea.vmem %s4845_s5, %s2402_s25 }
  0xf8   : > { %v4200_v33 = vpop.permute.xlu1 %2788  ;;  %v1563_v38 = vsel %vm1545_vm5, %v1530_v7, %v2706_v8  ;;  %v1562_v12 = vsel %vm1545_vm5, %v1529_v31, %v2705_v11  ;;  %v1581_v43 = vsel %vm1578_vm6, %v1548_v44, %v2750_v54  ;;  %v2780_v63 = vunpack.i.l.bf16 %v4163_v16 }
  0xf9   : > { %v4204_v60 = vpop.permute.xlu0 %2783  ;;  %v2781_v42 = vunpack.i.h.bf16 %v4163_v16  ;;  %v2776_v39 = vunpack.i.h.bf16 %v4168_v45  ;;  %v2791_v2 = vunpack.i.h.bf16 %v4200_v33  ;;  %v2790_v13 = vunpack.i.l.bf16 %v4200_v33 }
  0xfa   : > { %3078 = vrot.lane.b32.xlu1 %v4161_v27, %s3179_s8  ;;  %v1582_v55 = vsel %vm1578_vm6, %v1549_v24, %v2751_v29  ;;  %v1579_v17 = vsel %vm1578_vm6, %v1546_v20, %v2745_v35  ;;  %v2785_v15 = vunpack.i.l.bf16 %v4204_v60  ;;  %v1580_v16 = vsel %vm1578_vm6, %v1547_v46, %v2746_v51 }
  0xfb   : > { %3073 = vrot.lane.b32.xlu0 %v4982_v25, %s3179_s8  ;;  %v1595_v0 = vsel %vm1578_vm6, %v1562_v12, %v2770_v53  ;;  %v1596_v40 = vsel %vm1578_vm6, %v1563_v38, %v2771_v6  ;;  %v2775_v33 = vunpack.i.l.bf16 %v4168_v45  ;;  %v1612_v31 = vsel %vm1611_vm7, %v1579_v17, %v2780_v63 }
  0xfc   : > { %v4228_v1 = vpop.permute.xlu1 %2798  ;;  %v1613_v54 = vsel %vm1611_vm7, %v1580_v16, %v2781_v42  ;;  %v1598_v7 = vsel %vm1578_vm6, %v1565_v26, %v2776_v39  ;;  %v1614_v44 = vsel %vm1611_vm7, %v1581_v43, %v2790_v13  ;;  %v1615_v24 = vsel %vm1611_vm7, %v1582_v55, %v2791_v2 }
  0xfd   : > { %v4234_v48 = vpop.permute.xlu0 %2793  ;;  %v2801_v8 = vunpack.i.h.bf16 %v4228_v1  ;;  %v4993_v53 = vpack.i.bf16 %v4193_v52, %v4190_v36 }
  0xfe   : > { %3088 = vrot.lane.b32.xlu1 %v4988_v21, %s3180_s11  ;;  %v2786_v21 = vunpack.i.h.bf16 %v4204_v60  ;;  %v2800_v60 = vunpack.i.l.bf16 %v4228_v1  ;;  %v4992_v1 = vpack.i.bf16 %v4111_v56, %v4109_v22  ;;  %v2795_v26 = vunpack.i.l.bf16 %v4234_v48 }
  0xff   : > { %3083 = vrot.lane.b32.xlu0 %v4989_v28, %s3180_s11  ;;  %v1646_v56 = vsel %vm1644_vm8, %v1613_v54, %v2801_v8 }
 0x100   : > { %v4252_v10 = vpop.permute.xlu1 %2808  ;;  %v1629_v20 = vsel %vm1611_vm7, %v1596_v40, %v2786_v21  ;;  %v1645_v22 = vsel %vm1644_vm8, %v1612_v31, %v2800_v60 }
 0x101   : > { %v4258_v28 = vpop.permute.xlu0 %2803  ;;  %v2811_v51 = vunpack.i.h.bf16 %v4252_v10 }
 0x102   : > { %3098 = vrot.lane.b32.xlu1 %v4990_v14, %s3180_s11  ;;  %v2796_v14 = vunpack.i.h.bf16 %v4234_v48  ;;  %v2805_v6 = vunpack.i.l.bf16 %v4258_v28  ;;  %v2806_v38 = vunpack.i.h.bf16 %v4258_v28 }
 0x103   : > { %3093 = vrot.lane.b32.xlu0 %v4991_v4, %s3180_s11  ;;  %v1648_v28 = vsel %vm1644_vm8, %v1615_v24, %v2811_v51 }
 0x104   : > { %v2819_v18 = vpop.permute.xlu1 %2818  ;;  %v1662_v16 = vsel %vm1644_vm8, %v1629_v20, %v2806_v38  ;;  %v4995_v20 = vld [vmem:[#allocation15_spill] sm:$0xff] }
 0x105   : > { %v4284_v57 = vpop.permute.xlu0 %2813  ;;  %v2821_v29 = vunpack.i.h.bf16 %v2819_v18  ;;  %v2820_v35 = vunpack.i.l.bf16 %v2819_v18 }
 0x106   : > { %3108 = vrot.lane.b32.xlu1 %v4131_v5, %s3181_s16  ;;  %v2810_v5 = vunpack.i.l.bf16 %v4252_v10  ;;  %v2816_v17 = vunpack.i.h.bf16 %v4284_v57  ;;  %v2815_v21 = vunpack.i.l.bf16 %v4284_v57 }
 0x107   : > { %3103 = vrot.lane.b32.xlu0 %v4136_v50, %s3181_s16  ;;  %v1628_v50 = vsel %vm1611_vm7, %v1595_v0, %v2785_v15  ;;  %v1678_v36 = vsel %vm1677_vm9, %v1645_v22, %v2820_v35  ;;  %v1679_v52 = vsel %vm1677_vm9, %v1646_v56, %v2821_v29  ;;  %v4996_v56 = vld [vmem:[#allocation5_spill] sm:$0xff] }
 0x108   : > { %v2829_v11 = vpop.permute.xlu1 %2828  ;;  %v1647_v4 = vsel %vm1644_vm8, %v1614_v44, %v2810_v5  ;;  %v1661_v55 = vsel %vm1644_vm8, %v1628_v50, %v2805_v6  ;;  %v1631_v6 = vsel %vm1611_vm7, %v1598_v7, %v2796_v14 }
 0x109   : > { %v2824_v46 = vpop.permute.xlu0 %2823  ;;  %v2831_v43 = vunpack.i.h.bf16 %v2829_v11  ;;  %v2830_v48 = vunpack.i.l.bf16 %v2829_v11  ;;  %v4994_v11 = vpack.i.bf16 %v4180_v41, %v4177_v49  ;;  %v1597_v49 = vsel %vm1578_vm6, %v4262_v9, %v2775_v33 }
 0x10a   : > { %3118 = vrot.lane.b32.xlu1 %v4992_v1, %s3181_s16  ;;  %v2826_v42 = vunpack.i.h.bf16 %v2824_v46  ;;  %v2825_v39 = vunpack.i.l.bf16 %v2824_v46  ;;  %v1630_v51 = vsel %vm1611_vm7, %v1597_v49, %v2795_v26  ;;  %v1664_v45 = vsel %vm1644_vm8, %v1631_v6, %v2816_v17  ;;  %v5000_v17 = vld [vmem:[#allocation33_spill] sm:$0xff]  ;;  %v5010_v6 = vld [vmem:[#allocation27_spill] sm:$0xff] }
 0x10b   : > { %3113 = vrot.lane.b32.xlu0 %v4993_v53, %s3181_s16  ;;  %v1680_v0 = vsel %vm1677_vm9, %v1647_v4, %v2830_v48  ;;  %v1681_v40 = vsel %vm1677_vm9, %v1648_v28, %v2831_v43  ;;  %v1663_v38 = vsel %vm1644_vm8, %v1630_v51, %v2815_v21  ;;  %v2511_v43 = vunpack.i.h.bf16 %v4996_v56  ;;  %v5008_v49 = vld [vmem:[#allocation37_spill] sm:$0xff] }
 0x10c   : > { %v2839_v12 = vpop.permute.xlu1 %2838  ;;  %v1694_v57 = vsel %vm1677_vm9, %v1661_v55, %v2825_v39  ;;  %v1695_v54 = vsel %vm1677_vm9, %v1662_v16, %v2826_v42  ;;  %v2510_v48 = vunpack.i.l.bf16 %v4996_v56  ;;  %v2601_v21 = vunpack.i.h.bf16 %v5000_v17 }
 0x10d   : > { %v2841_v63 = vunpack.i.h.bf16 %v2839_v12  ;;  %v2840_v10 = vunpack.i.l.bf16 %v2839_v12  ;;  %v2834_v18 = vpop.permute.xlu0 %2833 }
 0x10e   : > { %3128 = vrot.lane.b32.xlu1 %v4161_v27, %s3182_s17  ;;  %v2836_v44 = vunpack.i.h.bf16 %v2834_v18  ;;  %v2835_v24 = vunpack.i.l.bf16 %v2834_v18 }
 0x10f   : > { %3123 = vrot.lane.b32.xlu0 %v4982_v25, %s3182_s17  ;;  %v1711_v2 = vsel %vm1710_vm10, %v1678_v36, %v2840_v10  ;;  %v1712_v13 = vsel %vm1710_vm10, %v1679_v52, %v2841_v63  ;;  %v4997_v63 = vld [vmem:[#allocation2_spill] sm:$0xff]  ;;  %v4998_v36 = vld [vmem:[#allocation7_spill] sm:$0xff] }
 0x110   : > { %v2849_v27 = vpop.permute.xlu1 %2848  ;;  %v1743_v15 = vpack.c.bf16 %v1712_v13, %v1711_v2  ;;  %v1696_v9 = vsel %vm1677_vm9, %v1663_v38, %v2835_v24  ;;  %v1697_v33 = vsel %vm1677_vm9, %v1664_v45, %v2836_v44  ;;  %v2516_v10 = vunpack.i.h.bf16 %v4997_v63  ;;  %v4999_v2 = vld [vmem:[#allocation6_spill] sm:$0xff] }
 0x111   : > { %v2851_v31 = vunpack.i.h.bf16 %v2849_v27  ;;  %v2850_v25 = vunpack.i.l.bf16 %v2849_v27  ;;  %v2844_v8 = vpop.permute.xlu0 %2843  ;;  %v2515_v39 = vunpack.i.l.bf16 %v4997_v63  ;;  %v2561_v52 = vunpack.i.h.bf16 %v4998_v36  ;;  %v5011_v38 = vld [vmem:[#allocation38_spill] sm:$0xff] }
 0x112   : > { %v2846_v60 = vunpack.i.h.bf16 %v2844_v8  ;;  %v2845_v5 = vunpack.i.l.bf16 %v2844_v8  ;;  %3138 = vrot.lane.b32.xlu1 %v4994_v11, %s3182_s17  ;;  %2429 = vmatprep.mubr.msk.bf16.mxu0 %vm1786_vm11, %v1743_v15  ;;  %v2560_v28 = vunpack.i.l.bf16 %v4998_v36  ;;  %v2556_v13 = vunpack.i.h.bf16 %v4999_v2  ;;  %v5001_v15 = vld [vmem:[#allocation19_spill] sm:$0xff] }
 0x113   : > { %v1713_v46 = vsel %vm1710_vm10, %v1680_v0, %v2850_v25  ;;  %v1714_v50 = vsel %vm1710_vm10, %v1681_v40, %v2851_v31  ;;  %3133 = vrot.lane.b32.xlu0 %v4995_v20, %s3182_s17  ;;  %v2555_v55 = vunpack.i.l.bf16 %v4999_v2  ;;  %v1484_v16 = vsel %vm1479_vm3, %v5001_v15, %v2510_v48  ;;  %v5002_v0 = vld [vmem:[#allocation18_spill] sm:$0xff]  ;;  %v5003_v31 = vld [vmem:[#allocation21_spill] sm:$0xff]  ;;  %v5005_v11 = vld [vmem:[#allocation31_spill] sm:$0xff] }
 0x114   : > { %v1744_v41 = vpack.c.bf16 %v1714_v50, %v1713_v46  ;;  %v4354_v29 = vpop.permute.xlu1 %2858  ;;  %v1727_v35 = vsel %vm1710_vm10, %v1694_v57, %v2845_v5  ;;  %v1728_v1 = vsel %vm1710_vm10, %v1695_v54, %v2846_v60  ;;  %v1485_v40 = vsel %vm1479_vm3, %v5002_v0, %v2511_v43  ;;  %v5004_v60 = vld [vmem:[#allocation22_spill] sm:$0xff]  ;;  %v5007_v46 = vld [vmem:[#allocation32_spill] sm:$0xff] }
 0x115   : > { %v2854_v53 = vpop.permute.xlu0 %2853  ;;  %v1751_v4 = vpack.c.bf16 %v1728_v1, %v1727_v35  ;;  %v1487_v25 = vsel %vm1479_vm3, %v5003_v31, %v2516_v10  ;;  %v1486_v5 = vsel %vm1479_vm3, %v5004_v60, %v2515_v39  ;;  %v1503_v57 = vsel %vm1479_vm3, %v5005_v11, %v2561_v52  ;;  %v5006_v54 = vld [vmem:[#allocation34_spill] sm:$0xff] }
 0x116   : > { %v2856_v12 = vunpack.i.h.bf16 %v2854_v53  ;;  %v2855_v22 = vunpack.i.l.bf16 %v2854_v53  ;;  %2430 = vmatmul.mubr.msk.bf16.vlgmr.msra.gmra.mrb[0].mxu0 %vm1786_vm11, %v1744_v41  ;;  %v2596_v44 = vunpack.i.h.bf16 %v5006_v54  ;;  %v2600_v24 = vunpack.i.l.bf16 %v5000_v17  ;;  %v5009_v1 = vld [vmem:[#allocation26_spill] sm:$0xff] }
 0x117   : > { %2445 = vmatprep.mubr.msk.bf16.mxu1 %vm1786_vm11, %v1751_v4  ;;  %v1502_v50 = vsel %vm1479_vm3, %v5007_v46, %v2560_v28  ;;  %v2595_v20 = vunpack.i.l.bf16 %v5006_v54  ;;  %v2641_v41 = vunpack.i.h.bf16 %v5008_v49  ;;  %v2640_v35 = vunpack.i.l.bf16 %v5008_v49 }
 0x118   : > { %v1729_v26 = vsel %vm1710_vm10, %v1696_v9, %v2855_v22  ;;  %v1730_v7 = vsel %vm1710_vm10, %v1697_v33, %v2856_v12  ;;  %v4368_v14 = vpop.permute.xlu1 %2868  ;;  %v1501_v51 = vsel %vm1479_vm3, %v5009_v1, %v2556_v13  ;;  %v1500_v53 = vsel %vm1479_vm3, %v5010_v6, %v2555_v55  ;;  %v5012_v9 = vld [vmem:[#allocation11_spill] sm:$0xff] }
 0x119   : > { %v1752_v18 = vpack.c.bf16 %v1730_v7, %v1729_v26  ;;  %v4373_v42 = vpop.permute.xlu0 %2863  ;;  %v1520_v4 = vsel %vm1512_vm4, %v1487_v25, %v2601_v21  ;;  %v2635_v45 = vunpack.i.l.bf16 %v5011_v38  ;;  %v2636_v22 = vunpack.i.h.bf16 %v5011_v38  ;;  %v5013_v7 = vld [vmem:[#allocation4_spill] sm:$0xff] }
 0x11a   : > { %v2681_v33 = vunpack.i.h.bf16 %v5012_v9  ;;  %v2680_v26 = vunpack.i.l.bf16 %v5012_v9  ;;  %v2676_v56 = vunpack.i.h.bf16 %v5013_v7  ;;  %v1518_v48 = vsel %vm1512_vm4, %v1485_v40, %v2596_v44 }
 0x11b   : > { %2446 = vmatmul.mubr.msk.bf16.vlgmr.msra.gmra.mrb[0].mxu1 %vm1786_vm11, %v1752_v18  ;;  %v1519_v63 = vsel %vm1512_vm4, %v1486_v5, %v2600_v24  ;;  %v2675_v10 = vunpack.i.l.bf16 %v5013_v7  ;;  %v2720_v18 = vunpack.i.l.bf16 %v4027_v37  ;;  %v1517_v39 = vsel %vm1512_vm4, %v1484_v16, %v2595_v20 }
 0x11c   : > { %v4382_v27 = vpop.permute.xlu1 %2878  ;;  %v1536_v36 = vsel %vm1512_vm4, %v1503_v57, %v2641_v41  ;;  %v1535_v52 = vsel %vm1512_vm4, %v1502_v50, %v2640_v35  ;;  %v2721_v28 = vunpack.i.h.bf16 %v4027_v37  ;;  %v1533_v2 = vsel %vm1512_vm4, %v1500_v53, %v2635_v45 }
 0x11d   : > { %v4390_v8 = vpop.permute.xlu0 %2873  ;;  %v2716_v13 = vunpack.i.h.bf16 %v4031_v47  ;;  %v2715_v55 = vunpack.i.l.bf16 %v4031_v47  ;;  %v2760_v17 = vunpack.i.l.bf16 %v4119_v32  ;;  %v1534_v15 = vsel %vm1512_vm4, %v1501_v51, %v2636_v22 }
 0x11e   : > { %v1552_v16 = vsel %vm1545_vm5, %v1519_v63, %v2680_v26  ;;  %v1553_v0 = vsel %vm1545_vm5, %v1520_v4, %v2681_v33  ;;  %v1551_v40 = vsel %vm1545_vm5, %v1518_v48, %v2676_v56  ;;  %v1550_v37 = vsel %vm1545_vm5, %v1517_v39, %v2675_v10 }
 0x11f   : > { %v4439_v25 = vsel %vm1545_vm5, %v1535_v52, %v2720_v18  ;;  %v2761_v47 = vunpack.i.h.bf16 %v4119_v32  ;;  %v2755_v60 = vunpack.i.l.bf16 %v4123_v62  ;;  %v1569_v5 = vsel %vm1545_vm5, %v1536_v36, %v2721_v28 }
 0x120   : > { %v4409_v12 = vpop.permute.xlu1 %2888  ;;  %v2756_v11 = vunpack.i.h.bf16 %v4123_v62  ;;  %v2861_v57 = vunpack.i.h.bf16 %v4354_v29  ;;  %v2860_v54 = vunpack.i.l.bf16 %v4354_v29  ;;  %v1567_v44 = vsel %vm1545_vm5, %v1534_v15, %v2716_v13 }
 0x121   : > { %v4415_v43 = vpop.permute.xlu0 %2883  ;;  %v1566_v24 = vsel %vm1545_vm5, %v1533_v2, %v2715_v55  ;;  %v1585_v46 = vsel %vm1578_vm6, %v1552_v16, %v2760_v17  ;;  %v2870_v50 = vunpack.i.l.bf16 %v4368_v14  ;;  %v2871_v32 = vunpack.i.h.bf16 %v4368_v14 }
 0x122   : > { %v2866_v49 = vunpack.i.h.bf16 %v4373_v42  ;;  %v2881_v41 = vunpack.i.h.bf16 %v4382_v27  ;;  %v2880_v62 = vunpack.i.l.bf16 %v4382_v27  ;;  %v1586_v29 = vsel %vm1578_vm6, %v1553_v0, %v2761_v47 }
 0x123   : > { %v1583_v1 = vsel %vm1578_vm6, %v1550_v37, %v2755_v60  ;;  %v2876_v51 = vunpack.i.h.bf16 %v4390_v8  ;;  %v2875_v6 = vunpack.i.l.bf16 %v4390_v8  ;;  %v1584_v53 = vsel %vm1578_vm6, %v1551_v40, %v2756_v11 }
 0x124   : > { %v4429_v21 = vpop.permute.xlu1 %2898  ;;  %v1599_v14 = vsel %vm1578_vm6, %v1566_v24, %v2860_v54  ;;  %v1600_v4 = vsel %vm1578_vm6, %v1567_v44, %v2861_v57  ;;  %v2865_v38 = vunpack.i.l.bf16 %v4373_v42  ;;  %v1616_v27 = vsel %vm1611_vm7, %v1583_v1, %v2870_v50 }
 0x125   : > { %v4435_v31 = vpop.permute.xlu0 %2893  ;;  %v2891_v45 = vunpack.i.h.bf16 %v4409_v12  ;;  %v2890_v22 = vunpack.i.l.bf16 %v4409_v12  ;;  %v2900_v9 = vunpack.i.l.bf16 %v4429_v21  ;;  %v1617_v26 = vsel %vm1611_vm7, %v1584_v53, %v2871_v32 }
 0x126   : > { %v1602_v8 = vsel %vm1578_vm6, %v1569_v5, %v2866_v49  ;;  %v1618_v7 = vsel %vm1611_vm7, %v1585_v46, %v2880_v62  ;;  %v1619_v56 = vsel %vm1611_vm7, %v1586_v29, %v2881_v41  ;;  %v1632_v42 = vsel %vm1611_vm7, %v1599_v14, %v2875_v6 }
 0x127   : > { %v1633_v63 = vsel %vm1611_vm7, %v1600_v4, %v2876_v51  ;;  %v2886_v12 = vunpack.i.h.bf16 %v4415_v43  ;;  %v2885_v39 = vunpack.i.l.bf16 %v4415_v43  ;;  %v2901_v36 = vunpack.i.h.bf16 %v4429_v21 }
 0x128   : > { %v2909_v20 = vpop.permute.xlu1 %2908  ;;  %v2895_v52 = vunpack.i.l.bf16 %v4435_v31  ;;  %v1649_v28 = vsel %vm1644_vm8, %v1616_v27, %v2890_v22  ;;  %v1650_v2 = vsel %vm1644_vm8, %v1617_v26, %v2891_v45  ;;  %v1651_v13 = vsel %vm1644_vm8, %v1618_v7, %v2900_v9 }
 0x129   : > { %v4455_v35 = vpop.permute.xlu0 %2903  ;;  %v2911_v10 = vunpack.i.h.bf16 %v2909_v20  ;;  %v2910_v18 = vunpack.i.l.bf16 %v2909_v20  ;;  %v2896_v55 = vunpack.i.h.bf16 %v4435_v31  ;;  %v1652_v5 = vsel %vm1644_vm8, %v1619_v56, %v2901_v36 }
 0x12a   : > { %v1665_v11 = vsel %vm1644_vm8, %v1632_v42, %v2895_v52  ;;  %v2906_v44 = vunpack.i.h.bf16 %v4455_v35  ;;  %v2905_v24 = vunpack.i.l.bf16 %v4455_v35  ;;  %v1601_v27 = vsel %vm1578_vm6, %v4439_v25, %v2865_v38 }
 0x12b   : > { %v1682_v43 = vsel %vm1677_vm9, %v1649_v28, %v2910_v18  ;;  %v1683_v21 = vsel %vm1677_vm9, %v1650_v2, %v2911_v10  ;;  %v1666_v54 = vsel %vm1644_vm8, %v1633_v63, %v2896_v55  ;;  %v1634_v26 = vsel %vm1611_vm7, %v1601_v27, %v2885_v39 }
 0x12c   : > { %v2919_v33 = vpop.permute.xlu1 %2918  ;;  %v1635_v7 = vsel %vm1611_vm7, %v1602_v8, %v2886_v12  ;;  %v1667_v42 = vsel %vm1644_vm8, %v1634_v26, %v2905_v24 }
 0x12d   : > { %v2914_v48 = vpop.permute.xlu0 %2913  ;;  %v2921_v15 = vunpack.i.h.bf16 %v2919_v33  ;;  %v2920_v16 = vunpack.i.l.bf16 %v2919_v33  ;;  %v1668_v63 = vsel %vm1644_vm8, %v1635_v7, %v2906_v44 }
 0x12e   : > { %v2916_v47 = vunpack.i.h.bf16 %v2914_v48  ;;  %v2915_v60 = vunpack.i.l.bf16 %v2914_v48 }
 0x12f   : > { %v1684_v20 = vsel %vm1677_vm9, %v1651_v13, %v2920_v16  ;;  %v1685_v32 = vsel %vm1677_vm9, %v1652_v5, %v2921_v15  ;;  %v2766_v16 = vunpack.i.h.bf16 %v4142_v59 }
 0x130   : > { %v2929_v17 = vpop.permute.xlu1 %2928  ;;  %v1698_v29 = vsel %vm1677_vm9, %v1665_v11, %v2915_v60  ;;  %v1699_v1 = vsel %vm1677_vm9, %v1666_v54, %v2916_v47 }
 0x131   : > { %v2931_v0 = vunpack.i.h.bf16 %v2929_v17  ;;  %v2930_v40 = vunpack.i.l.bf16 %v2929_v17  ;;  %v2924_v37 = vpop.permute.xlu0 %2923  ;;  %v1588_v44 = vsel %vm1578_vm6, %v3984_v30, %v2766_v16 }
 0x132   : > { %v2926_v53 = vunpack.i.h.bf16 %v2924_v37  ;;  %v2925_v14 = vunpack.i.l.bf16 %v2924_v37 }
 0x133   : > { %v1715_v57 = vsel %vm1710_vm10, %v1682_v43, %v2930_v40  ;;  %v1716_v31 = vsel %vm1710_vm10, %v1683_v21, %v2931_v0  ;;  %v2765_v0 = vunpack.i.l.bf16 %v4142_v59 }
 0x134   : > { %v1745_v46 = vpack.c.bf16 %v1716_v31, %v1715_v57  ;;  %v2939_v50 = vpop.permute.xlu1 %2938  ;;  %v1700_v25 = vsel %vm1677_vm9, %v1667_v42, %v2925_v14  ;;  %v1701_v38 = vsel %vm1677_vm9, %v1668_v63, %v2926_v53 }
 0x135   : > { %v2941_v49 = vunpack.i.h.bf16 %v2939_v50  ;;  %v2940_v41 = vunpack.i.l.bf16 %v2939_v50  ;;  %v2934_v62 = vpop.permute.xlu0 %2933  ;;  %v1587_v54 = vsel %vm1578_vm6, %v3987_v58, %v2765_v0 }
 0x136   : > { %v2936_v51 = vunpack.i.h.bf16 %v2934_v62  ;;  %v2935_v6 = vunpack.i.l.bf16 %v2934_v62  ;;  %2433 = vmatprep.mubr.msk.bf16.mxu0 %vm1786_vm11, %v1745_v46 }
 0x137   : > { %v1717_v35 = vsel %vm1710_vm10, %v1684_v20, %v2940_v41  ;;  %v1718_v4 = vsel %vm1710_vm10, %v1685_v32, %v2941_v49  ;;  %v5014_v49 = vld [vmem:[#allocation40_spill] sm:$0xff] }
 0x138   : > { %v1746_v45 = vpack.c.bf16 %v1718_v4, %v1717_v35  ;;  %v1731_v22 = vsel %vm1710_vm10, %v1698_v29, %v2935_v6  ;;  %v1732_v9 = vsel %vm1710_vm10, %v1699_v1, %v2936_v51  ;;  %v2949_v33 = vpop.permute.xlu1 %2948 }
 0x139   : > { %v1753_v56 = vpack.c.bf16 %v1732_v9, %v1731_v22  ;;  %v2944_v48 = vpop.permute.xlu0 %2943  ;;  %v2951_v40 = vunpack.i.h.bf16 %v2949_v33  ;;  %v2950_v37 = vunpack.i.l.bf16 %v2949_v33 }
 0x13a   : > { %v2946_v10 = vunpack.i.h.bf16 %v2944_v48  ;;  %v2945_v18 = vunpack.i.l.bf16 %v2944_v48  ;;  %2434 = vmatmul.mubr.msk.bf16.gmra.mrb[4].mxu0 %vm1786_vm11, %v1746_v45 }
 0x13b   : > { %2449 = vmatprep.mubr.msk.bf16.mxu1 %vm1786_vm11, %v1753_v56  ;;  %v1603_v59 = vsel %vm1578_vm6, %v4079_v61, %v2950_v37  ;;  %v1604_v24 = vsel %vm1578_vm6, %v4076_v23, %v2951_v40 }
 0x13c   : > { %v1733_v39 = vsel %vm1710_vm10, %v1700_v25, %v2945_v18  ;;  %v1734_v8 = vsel %vm1710_vm10, %v1701_v38, %v2946_v10  ;;  %v2959_v12 = vpop.permute.xlu1 %2958 }
 0x13d   : > { %v1754_v36 = vpack.c.bf16 %v1734_v8, %v1733_v39  ;;  %v2954_v52 = vpop.permute.xlu0 %2953  ;;  %v2961_v43 = vunpack.i.h.bf16 %v2959_v12  ;;  %v2960_v21 = vunpack.i.l.bf16 %v2959_v12 }
 0x13e   : > { %v2956_v47 = vunpack.i.h.bf16 %v2954_v52  ;;  %v2955_v60 = vunpack.i.l.bf16 %v2954_v52 }
 0x13f   : > { %2450 = vmatmul.mubr.msk.bf16.gmra.mrb[4].mxu1 %vm1786_vm11, %v1754_v36  ;;  %v1605_v20 = vsel %vm1578_vm6, %v4061_v34, %v2960_v21  ;;  %v1606_v32 = vsel %vm1578_vm6, %v4064_v3, %v2961_v43 }
 0x140   : > { %v2969_v28 = vpop.permute.xlu1 %2968  ;;  %v1590_v58 = vsel %vm1578_vm6, %v3975_v19, %v2956_v47  ;;  %v1589_v30 = vsel %vm1578_vm6, %v5014_v49, %v2955_v60 }
 0x141   : > { %v2964_v2 = vpop.permute.xlu0 %2963  ;;  %v2971_v11 = vunpack.i.h.bf16 %v2969_v28  ;;  %v2970_v57 = vunpack.i.l.bf16 %v2969_v28 }
 0x142   : > { %v2966_v46 = vunpack.i.h.bf16 %v2964_v2  ;;  %v2965_v50 = vunpack.i.l.bf16 %v2964_v2 }
 0x143   : > { %v1636_v61 = vsel %vm1611_vm7, %v1603_v59, %v2970_v57  ;;  %v1637_v62 = vsel %vm1611_vm7, %v1604_v24, %v2971_v11 }
 0x144   : > { %v2979_v13 = vpop.permute.xlu1 %2978  ;;  %v1620_v3 = vsel %vm1611_vm7, %v1587_v54, %v2965_v50  ;;  %v1621_v14 = vsel %vm1611_vm7, %v1588_v44, %v2966_v46 }
 0x145   : > { %v2974_v55 = vpop.permute.xlu0 %2973  ;;  %v2981_v23 = vunpack.i.h.bf16 %v2979_v13  ;;  %v2980_v29 = vunpack.i.l.bf16 %v2979_v13 }
 0x146   : > { %v2976_v51 = vunpack.i.h.bf16 %v2974_v55  ;;  %v2975_v6 = vunpack.i.l.bf16 %v2974_v55 }
 0x147   : > { %v1638_v33 = vsel %vm1611_vm7, %v1605_v20, %v2980_v29  ;;  %v1639_v26 = vsel %vm1611_vm7, %v1606_v32, %v2981_v23 }
 0x148   : > { %v2989_v17 = vpop.permute.xlu1 %2988  ;;  %v1622_v42 = vsel %vm1611_vm7, %v1589_v30, %v2975_v6  ;;  %v1623_v63 = vsel %vm1611_vm7, %v1590_v58, %v2976_v51 }
 0x149   : > { %v2984_v15 = vpop.permute.xlu0 %2983  ;;  %v2991_v34 = vunpack.i.h.bf16 %v2989_v17  ;;  %v2990_v53 = vunpack.i.l.bf16 %v2989_v17 }
 0x14a   : > { %v2986_v19 = vunpack.i.h.bf16 %v2984_v15  ;;  %v2985_v35 = vunpack.i.l.bf16 %v2984_v15 }
 0x14b   : > { %v1669_v10 = vsel %vm1644_vm8, %v1636_v61, %v2990_v53  ;;  %v1670_v18 = vsel %vm1644_vm8, %v1637_v62, %v2991_v34 }
 0x14c   : > { %v2999_v5 = vpop.permute.xlu1 %2998  ;;  %v1653_v25 = vsel %vm1644_vm8, %v1620_v3, %v2985_v35  ;;  %v1654_v38 = vsel %vm1644_vm8, %v1621_v14, %v2986_v19 }
 0x14d   : > { %v4516_v31 = vpop.permute.xlu0 %2993  ;;  %v3001_v4 = vunpack.i.h.bf16 %v2999_v5  ;;  %v3000_v27 = vunpack.i.l.bf16 %v2999_v5 }
 0x14e   : > { %v2996_v39 = vunpack.i.h.bf16 %v4516_v31  ;;  %v2995_v8 = vunpack.i.l.bf16 %v4516_v31 }
 0x14f   : > { %v1671_v12 = vsel %vm1644_vm8, %v1638_v33, %v3000_v27  ;;  %v1672_v36 = vsel %vm1644_vm8, %v1639_v26, %v3001_v4 }
 0x150   : > { %v3009_v41 = vpop.permute.xlu1 %3008  ;;  %v1655_v11 = vsel %vm1644_vm8, %v1622_v42, %v2995_v8  ;;  %v1656_v59 = vsel %vm1644_vm8, %v1623_v63, %v2996_v39  ;;  %v5015_v39 = vld [vmem:[#allocation46_spill] sm:$0xff] }
 0x151   : > { %v3004_v1 = vpop.permute.xlu0 %3003  ;;  %v3011_v45 = vunpack.i.h.bf16 %v3009_v41  ;;  %v3010_v22 = vunpack.i.l.bf16 %v3009_v41 }
 0x152   : > { %v3006_v7 = vunpack.i.h.bf16 %v3004_v1  ;;  %v3005_v56 = vunpack.i.l.bf16 %v3004_v1 }
 0x153   : > { %v1702_v52 = vsel %vm1677_vm9, %v1669_v10, %v3010_v22  ;;  %v1703_v28 = vsel %vm1677_vm9, %v1670_v18, %v3011_v45 }
 0x154   : > { %v3019_v9 = vpop.permute.xlu1 %3018  ;;  %v1686_v13 = vsel %vm1677_vm9, %v1653_v25, %v3005_v56  ;;  %v1687_v55 = vsel %vm1677_vm9, %v1654_v38, %v3006_v7 }
 0x155   : > { %v3014_v48 = vpop.permute.xlu0 %3013  ;;  %v3021_v0 = vunpack.i.h.bf16 %v3019_v9  ;;  %v3020_v40 = vunpack.i.l.bf16 %v3019_v9 }
 0x156   : > { %v3016_v21 = vunpack.i.h.bf16 %v3014_v48  ;;  %v3015_v47 = vunpack.i.l.bf16 %v3014_v48 }
 0x157   : > { %v1704_v32 = vsel %vm1677_vm9, %v1671_v12, %v3020_v40  ;;  %v1705_v58 = vsel %vm1677_vm9, %v1672_v36, %v3021_v0  ;;  %v5016_v12 = vld [vmem:[#allocation45_spill] sm:$0xff]  ;;  %v5020_v0 = vld [vmem:[#allocation3_spill] sm:$0xff] }
 0x158   : > { %v3029_v2 = vpop.permute.xlu1 %3028  ;;  %v1688_v41 = vsel %vm1677_vm9, %v1655_v11, %v3015_v47  ;;  %v1689_v61 = vsel %vm1677_vm9, %v1656_v59, %v3016_v21  ;;  %v5022_v21 = vld [vmem:[#allocation41_spill] sm:$0xff] }
 0x159   : > { %v3031_v17 = vunpack.i.h.bf16 %v3029_v2  ;;  %v3030_v15 = vunpack.i.l.bf16 %v3029_v2  ;;  %v3024_v16 = vpop.permute.xlu0 %3023  ;;  %v5018_v2 = vld [vmem:[#allocation43_spill] sm:$0xff] }
 0x15a   : > { %v3026_v37 = vunpack.i.h.bf16 %v3024_v16  ;;  %v3025_v43 = vunpack.i.l.bf16 %v3024_v16 }
 0x15b   : > { %v1735_v60 = vsel %vm1710_vm10, %v1702_v52, %v3030_v15  ;;  %v1736_v5 = vsel %vm1710_vm10, %v1703_v28, %v3031_v17  ;;  %v5017_v52 = vld [vmem:[#allocation44_spill] sm:$0xff]  ;;  %v5019_v15 = vld [vmem:[#allocation10_spill] sm:$0xff] }
 0x15c   : > { %v1755_v57 = vpack.c.bf16 %v1736_v5, %v1735_v60  ;;  %v1719_v31 = vsel %vm1710_vm10, %v1686_v13, %v3025_v43  ;;  %v1720_v54 = vsel %vm1710_vm10, %v1687_v55, %v3026_v37  ;;  %v3039_v44 = vpop.permute.xlu1 %3038  ;;  %v5021_v37 = vld [vmem:[#allocation42_spill] sm:$0xff] }
 0x15d   : > { %v1747_v24 = vpack.c.bf16 %v1720_v54, %v1719_v31  ;;  %v3041_v46 = vunpack.i.h.bf16 %v3039_v44  ;;  %v3040_v50 = vunpack.i.l.bf16 %v3039_v44  ;;  %v3034_v20 = vpop.permute.xlu0 %3033 }
 0x15e   : > { %v3036_v49 = vunpack.i.h.bf16 %v3034_v20  ;;  %v3035_v30 = vunpack.i.l.bf16 %v3034_v20  ;;  %2453 = vmatprep.mubr.msk.bf16.mxu1 %vm1786_vm11, %v1755_v57 }
 0x15f   : > { %v1737_v62 = vsel %vm1710_vm10, %v1704_v32, %v3040_v50  ;;  %v1738_v23 = vsel %vm1710_vm10, %v1705_v58, %v3041_v46  ;;  %2437 = vmatprep.mubr.msk.bf16.mxu0 %vm1786_vm11, %v1747_v24 }
 0x160   : > { %v1756_v29 = vpack.c.bf16 %v1738_v23, %v1737_v62  ;;  %v1721_v1 = vsel %vm1710_vm10, %v1688_v41, %v3035_v30  ;;  %v1722_v51 = vsel %vm1710_vm10, %v1689_v61, %v3036_v49  ;;  %v3049_v6 = vpop.permute.xlu1 %3048 }
 0x161   : > { %v1748_v34 = vpack.c.bf16 %v1722_v51, %v1721_v1  ;;  %v3044_v53 = vpop.permute.xlu0 %3043  ;;  %v3051_v9 = vunpack.i.h.bf16 %v3049_v6  ;;  %v3050_v33 = vunpack.i.l.bf16 %v3049_v6 }
 0x162   : > { %2454 = vmatmul.mubr.msk.bf16.gmra.mrb[8].mxu1 %vm1786_vm11, %v1756_v29  ;;  %v3046_v26 = vunpack.i.h.bf16 %v3044_v53  ;;  %v3045_v7 = vunpack.i.l.bf16 %v3044_v53 }
 0x163   : > { %2438 = vmatmul.mubr.msk.bf16.gmra.mrb[8].mxu0 %vm1786_vm11, %v1748_v34  ;;  %v1607_v8 = vsel %vm1578_vm6, %v5015_v39, %v3050_v33  ;;  %v1608_v36 = vsel %vm1578_vm6, %v5016_v12, %v3051_v9 }
 0x164   : > { %v3059_v3 = vpop.permute.xlu1 %3058  ;;  %v1591_v28 = vsel %vm1578_vm6, %v5017_v52, %v3045_v7  ;;  %v1592_v13 = vsel %vm1578_vm6, %v5018_v2, %v3046_v26 }
 0x165   : > { %v3054_v14 = vpop.permute.xlu0 %3053  ;;  %v3061_v56 = vunpack.i.h.bf16 %v3059_v3  ;;  %v3060_v48 = vunpack.i.l.bf16 %v3059_v3 }
 0x166   : > { %v3056_v42 = vunpack.i.h.bf16 %v3054_v14  ;;  %v3055_v63 = vunpack.i.l.bf16 %v3054_v14 }
 0x167   : > { %v1609_v16 = vsel %vm1578_vm6, %v5019_v15, %v3060_v48  ;;  %v1610_v40 = vsel %vm1578_vm6, %v5020_v0, %v3061_v56 }
 0x168   : > { %v3069_v19 = vpop.permute.xlu1 %3068  ;;  %v1594_v43 = vsel %vm1578_vm6, %v5021_v37, %v3056_v42  ;;  %v1593_v47 = vsel %vm1578_vm6, %v5022_v21, %v3055_v63 }
 0x169   : > { %v3064_v35 = vpop.permute.xlu0 %3063  ;;  %v3071_v18 = vunpack.i.h.bf16 %v3069_v19  ;;  %v3070_v25 = vunpack.i.l.bf16 %v3069_v19 }
 0x16a   : > { %v3066_v55 = vunpack.i.h.bf16 %v3064_v35  ;;  %v3065_v17 = vunpack.i.l.bf16 %v3064_v35 }
 0x16b   : > { %v1640_v5 = vsel %vm1611_vm7, %v1607_v8, %v3070_v25  ;;  %v1641_v11 = vsel %vm1611_vm7, %v1608_v36, %v3071_v18 }
 0x16c   : > { %v3079_v4 = vpop.permute.xlu1 %3078  ;;  %v1624_v50 = vsel %vm1611_vm7, %v1591_v28, %v3065_v17  ;;  %v1625_v20 = vsel %vm1611_vm7, %v1592_v13, %v3066_v55 }
 0x16d   : > { %v3074_v27 = vpop.permute.xlu0 %3073  ;;  %v3081_v57 = vunpack.i.h.bf16 %v3079_v4  ;;  %v3080_v31 = vunpack.i.l.bf16 %v3079_v4 }
 0x16e   : > { %v3076_v44 = vunpack.i.h.bf16 %v3074_v27  ;;  %v3075_v59 = vunpack.i.l.bf16 %v3074_v27 }
 0x16f   : > { %v1642_v23 = vsel %vm1611_vm7, %v1609_v16, %v3080_v31  ;;  %v1643_v29 = vsel %vm1611_vm7, %v1610_v40, %v3081_v57 }
 0x170   : > { %v3089_v45 = vpop.permute.xlu1 %3088  ;;  %v1626_v34 = vsel %vm1611_vm7, %v1593_v47, %v3075_v59  ;;  %v1627_v53 = vsel %vm1611_vm7, %v1594_v43, %v3076_v44 }
 0x171   : > { %v3084_v22 = vpop.permute.xlu0 %3083  ;;  %v3091_v24 = vunpack.i.h.bf16 %v3089_v45  ;;  %v3090_v46 = vunpack.i.l.bf16 %v3089_v45 }
 0x172   : > { %v3086_v32 = vunpack.i.h.bf16 %v3084_v22  ;;  %v3085_v58 = vunpack.i.l.bf16 %v3084_v22 }
 0x173   : > { %v1673_v3 = vsel %vm1644_vm8, %v1640_v5, %v3090_v46  ;;  %v1674_v14 = vsel %vm1644_vm8, %v1641_v11, %v3091_v24  ;;  %v4632_v24 = vld [vmem:[%s4844_s4] ss:$0 sm:$0xff] }
 0x174   : > { %v3099_v10 = vpop.permute.xlu1 %3098  ;;  %v1657_v19 = vsel %vm1644_vm8, %v1624_v50, %v3085_v58  ;;  %v1658_v35 = vsel %vm1644_vm8, %v1625_v20, %v3086_v32 }
 0x175   : > { %v4572_v38 = vpop.permute.xlu0 %3093  ;;  %v3101_v49 = vunpack.i.h.bf16 %v3099_v10  ;;  %v3100_v30 = vunpack.i.l.bf16 %v3099_v10 }
 0x176   : > { %v3096_v4 = vunpack.i.h.bf16 %v4572_v38  ;;  %v3095_v27 = vunpack.i.l.bf16 %v4572_v38 }
 0x177   : > { %v1675_v45 = vsel %vm1644_vm8, %v1642_v23, %v3100_v30  ;;  %v1676_v22 = vsel %vm1644_vm8, %v1643_v29, %v3101_v49 }
 0x178   : > { %v3109_v60 = vpop.permute.xlu1 %3108  ;;  %v1659_v52 = vsel %vm1644_vm8, %v1626_v34, %v3095_v27  ;;  %v1660_v17 = vsel %vm1644_vm8, %v1627_v53, %v3096_v4 }
 0x179   : > { %v3104_v54 = vpop.permute.xlu0 %3103  ;;  %v3111_v41 = vunpack.i.h.bf16 %v3109_v60  ;;  %v3110_v61 = vunpack.i.l.bf16 %v3109_v60 }
 0x17a   : > { %v3106_v1 = vunpack.i.h.bf16 %v3104_v54  ;;  %v3105_v51 = vunpack.i.l.bf16 %v3104_v54 }
 0x17b   : > { %v1706_v9 = vsel %vm1677_vm9, %v1673_v3, %v3110_v61  ;;  %v1707_v33 = vsel %vm1677_vm9, %v1674_v14, %v3111_v41 }
 0x17c   : > { %v3119_v62 = vpop.permute.xlu1 %3118  ;;  %v1690_v7 = vsel %vm1677_vm9, %v1657_v19, %v3105_v51  ;;  %v1691_v56 = vsel %vm1677_vm9, %v1658_v35, %v3106_v1 }
 0x17d   : > { %v3114_v6 = vpop.permute.xlu0 %3113  ;;  %v3121_v10 = vunpack.i.h.bf16 %v3119_v62  ;;  %v3120_v18 = vunpack.i.l.bf16 %v3119_v62 }
 0x17e   : > { %v3116_v39 = vunpack.i.h.bf16 %v3114_v6  ;;  %v3115_v8 = vunpack.i.l.bf16 %v3114_v6 }
 0x17f   : > { %v1708_v37 = vsel %vm1677_vm9, %v1675_v45, %v3120_v18  ;;  %v1709_v43 = vsel %vm1677_vm9, %v1676_v22, %v3121_v10 }
 0x180   : > { %v3129_v26 = vpop.permute.xlu1 %3128  ;;  %v1692_v60 = vsel %vm1677_vm9, %v1659_v52, %v3115_v8  ;;  %v1693_v5 = vsel %vm1677_vm9, %v1660_v17, %v3116_v39 }
 0x181   : > { %v3131_v48 = vunpack.i.h.bf16 %v3129_v26  ;;  %v3130_v42 = vunpack.i.l.bf16 %v3129_v26  ;;  %v3124_v63 = vpop.permute.xlu0 %3123 }
 0x182   : > { %v3126_v25 = vunpack.i.h.bf16 %v3124_v63  ;;  %v3125_v38 = vunpack.i.l.bf16 %v3124_v63 }
 0x183   : > { %v1739_v12 = vsel %vm1710_vm10, %v1706_v9, %v3130_v42  ;;  %v1740_v36 = vsel %vm1710_vm10, %v1707_v33, %v3131_v48 }
 0x184   : > { %v1757_v28 = vpack.c.bf16 %v1740_v36, %v1739_v12  ;;  %v1723_v2 = vsel %vm1710_vm10, %v1690_v7, %v3125_v38  ;;  %v1724_v13 = vsel %vm1710_vm10, %v1691_v56, %v3126_v25  ;;  %v3139_v55 = vpop.permute.xlu1 %3138 }
 0x185   : > { %v1749_v15 = vpack.c.bf16 %v1724_v13, %v1723_v2  ;;  %v3141_v16 = vunpack.i.h.bf16 %v3139_v55  ;;  %v3140_v0 = vunpack.i.l.bf16 %v3139_v55  ;;  %v3134_v40 = vpop.permute.xlu0 %3133 }
 0x186   : > { %v3136_v21 = vunpack.i.h.bf16 %v3134_v40  ;;  %v3135_v47 = vunpack.i.l.bf16 %v3134_v40  ;;  %2457 = vmatprep.mubr.msk.bf16.mxu1 %vm1786_vm11, %v1757_v28 }
 0x187   : > { %v1741_v11 = vsel %vm1710_vm10, %v1708_v37, %v3140_v0  ;;  %v1742_v57 = vsel %vm1710_vm10, %v1709_v43, %v3141_v16  ;;  %2441 = vmatprep.mubr.msk.bf16.mxu0 %vm1786_vm11, %v1749_v15 }
 0x188   : > { %v1758_v31 = vpack.c.bf16 %v1742_v57, %v1741_v11  ;;  %v1725_v54 = vsel %vm1710_vm10, %v1692_v60, %v3135_v47  ;;  %v1726_v44 = vsel %vm1710_vm10, %v1693_v5, %v3136_v21 }
 0x189   : > { %v1750_v59 = vpack.c.bf16 %v1726_v44, %v1725_v54 }
 0x18a   : > { %2458 = vmatmul.mubr.msk.bf16.gmra.mrb[12].mxu1 %vm1786_vm11, %v1758_v31 }
 0x18b   : > { %2442 = vmatmul.mubr.msk.bf16.gmra.mrb[12].mxu0 %vm1786_vm11, %v1750_v59 }
 0x1e9   : > { %v2431_v46 = vpop.f32.mrb[0].mxu0 }
 0x1ea   : > { %v1882_v50 = vadd.f32 %v2431_v46, %v4632_v24  ;;  %v1873_v20 = vpop.f32.mrb[1].mxu0 }
 0x1eb   : > { %v1874_v32 = vadd.f32 %v4632_v24, %v1873_v20  ;;  %v2432_v58 = vpop.f32.mrb[2].mxu0 }
 0x1ec   : > { %2002 = vst.msk [vmem:[%s4637_s6 + $0x20] sm:$0xff] %vm1512_vm4, %v1882_v50  ;;  %v1885_v49 = vadd.f32 %v2432_v58, %v4632_v24  ;;  %v1876_v30 = vpop.f32.mrb[3].mxu0 }
 0x1ed   : > { %2000 = vst.msk [vmem:[%s4637_s6] sm:$0xff] %vm1512_vm4, %v1874_v32  ;;  %v1877_v41 = vadd.f32 %v4632_v24, %v1876_v30 }
 0x1ee   : > { %2003 = vst.msk [vmem:[%s4637_s6 + $0x28] sm:$0xff] %vm1512_vm4, %v1885_v49  ;;  %v2447_v61 = vpop.f32.mrb[0].mxu1 }
 0x1ef   : > { %2001 = vst.msk [vmem:[%s4637_s6 + $0x8] sm:$0xff] %vm1512_vm4, %v1877_v41  ;;  %v1946_v62 = vadd.f32 %v2447_v61, %v4632_v24  ;;  %v1937_v23 = vpop.f32.mrb[1].mxu1 }
 0x1f0   : > { %v1938_v29 = vadd.f32 %v4632_v24, %v1937_v23  ;;  %v2448_v1 = vpop.f32.mrb[2].mxu1 }
 0x1f1   : > { %2018 = vst.msk [vmem:[%s4637_s6 + $0x120] sm:$0xff] %vm1512_vm4, %v1946_v62  ;;  %v1949_v51 = vadd.f32 %v2448_v1, %v4632_v24  ;;  %2100 = vrot.lane.b32.xlu0 %v1946_v62, %s3183_s18  ;;  %v1940_v6 = vpop.f32.mrb[3].mxu1 }
 0x1f2   : > { %2016 = vst.msk [vmem:[%s4637_s6 + $0x100] sm:$0xff] %vm1512_vm4, %v1938_v29  ;;  %v1941_v34 = vadd.f32 %v4632_v24, %v1940_v6 }
 0x1f3   : > { %2019 = vst.msk [vmem:[%s4637_s6 + $0x128] sm:$0xff] %vm1512_vm4, %v1949_v51  ;;  %2102 = vrot.lane.b32.xlu1 %v1949_v51, %s3183_s18 }
 0x1f4   : > { %2017 = vst.msk [vmem:[%s4637_s6 + $0x108] sm:$0xff] %vm1512_vm4, %v1941_v34 }
 0x1f5   : > { %2096 = vrot.lane.b32.xlu0 %v1938_v29, %s3183_s18 }
 0x1f7   : > { %2098 = vrot.lane.b32.xlu1 %v1941_v34, %s3183_s18 }
 0x1f9   : > { %2068 = vrot.lane.b32.xlu0 %v1882_v50, %s3183_s18 }
 0x1fb   : > { %2070 = vrot.lane.b32.xlu1 %v1885_v49, %s3183_s18 }
 0x1fd   : > { %2064 = vrot.lane.b32.xlu0 %v1874_v32, %s3183_s18 }
 0x1ff   : > { %2066 = vrot.lane.b32.xlu1 %v1877_v41, %s3183_s18 }
 0x20d   : > { %v2435_v53 = vpop.f32.mrb[4].mxu0 }
 0x20e   : > { %v1898_v3 = vadd.f32 %v2435_v53, %v4632_v24  ;;  %v1889_v14 = vpop.f32.mrb[5].mxu0 }
 0x20f   : > { %v1890_v19 = vadd.f32 %v4632_v24, %v1889_v14  ;;  %v2436_v35 = vpop.f32.mrb[6].mxu0 }
 0x210   : > { %2006 = vst.msk [vmem:[%s4637_s6 + $0x60] sm:$0xff] %vm1512_vm4, %v1898_v3  ;;  %v1901_v4 = vadd.f32 %v2436_v35, %v4632_v24  ;;  %v1892_v27 = vpop.f32.mrb[7].mxu0 }
 0x211   : > { %2004 = vst.msk [vmem:[%s4637_s6 + $0x40] sm:$0xff] %vm1512_vm4, %v1890_v19  ;;  %v1893_v45 = vadd.f32 %v4632_v24, %v1892_v27 }
 0x212   : > { %2007 = vst.msk [vmem:[%s4637_s6 + $0x68] sm:$0xff] %vm1512_vm4, %v1901_v4  ;;  %v2451_v22 = vpop.f32.mrb[4].mxu1 }
 0x213   : > { %2005 = vst.msk [vmem:[%s4637_s6 + $0x48] sm:$0xff] %vm1512_vm4, %v1893_v45  ;;  %v1962_v9 = vadd.f32 %v2451_v22, %v4632_v24  ;;  %v1953_v33 = vpop.f32.mrb[5].mxu1 }
 0x214   : > { %v1954_v26 = vadd.f32 %v4632_v24, %v1953_v33  ;;  %v2452_v7 = vpop.f32.mrb[6].mxu1 }
 0x215   : > { %2022 = vst.msk [vmem:[%s4637_s6 + $0x160] sm:$0xff] %vm1512_vm4, %v1962_v9  ;;  %v1965_v56 = vadd.f32 %v2452_v7, %v4632_v24  ;;  %v1956_v48 = vpop.f32.mrb[7].mxu1  ;;  %2108 = vrot.lane.b32.xlu0 %v1962_v9, %s3183_s18 }
 0x216   : > { %2020 = vst.msk [vmem:[%s4637_s6 + $0x140] sm:$0xff] %vm1512_vm4, %v1954_v26  ;;  %v1957_v42 = vadd.f32 %v4632_v24, %v1956_v48 }
 0x217   : > { %2023 = vst.msk [vmem:[%s4637_s6 + $0x168] sm:$0xff] %vm1512_vm4, %v1965_v56  ;;  %2110 = vrot.lane.b32.xlu1 %v1965_v56, %s3183_s18 }
 0x218   : > { %2021 = vst.msk [vmem:[%s4637_s6 + $0x148] sm:$0xff] %vm1512_vm4, %v1957_v42 }
 0x219   : > { %2104 = vrot.lane.b32.xlu0 %v1954_v26, %s3183_s18 }
 0x21b   : > { %2106 = vrot.lane.b32.xlu1 %v1957_v42, %s3183_s18 }
 0x21d   : > { %2076 = vrot.lane.b32.xlu0 %v1898_v3, %s3183_s18 }
 0x21f   : > { %2078 = vrot.lane.b32.xlu1 %v1901_v4, %s3183_s18 }
 0x221   : > { %2072 = vrot.lane.b32.xlu0 %v1890_v19, %s3183_s18 }
 0x223   : > { %2074 = vrot.lane.b32.xlu1 %v1893_v45, %s3183_s18 }
 0x235   : > { %v2455_v63 = vpop.f32.mrb[8].mxu1 }
 0x236   : > { %v2439_v10 = vpop.f32.mrb[8].mxu0  ;;  %v1978_v18 = vadd.f32 %v2455_v63, %v4632_v24  ;;  %v1969_v25 = vpop.f32.mrb[9].mxu1 }
 0x237   : > { %v1914_v38 = vadd.f32 %v2439_v10, %v4632_v24  ;;  %v1905_v39 = vpop.f32.mrb[9].mxu0  ;;  %v1970_v8 = vadd.f32 %v4632_v24, %v1969_v25  ;;  %v2456_v12 = vpop.f32.mrb[10].mxu1 }
 0x238   : > { %2026 = vst.msk [vmem:[%s4637_s6 + $0x1a0] sm:$0xff] %vm1512_vm4, %v1978_v18  ;;  %v1906_v36 = vadd.f32 %v4632_v24, %v1905_v39  ;;  %v2440_v52 = vpop.f32.mrb[10].mxu0  ;;  %v1981_v28 = vadd.f32 %v2456_v12, %v4632_v24  ;;  %v1972_v2 = vpop.f32.mrb[11].mxu1  ;;  %2116 = vrot.lane.b32.xlu0 %v1978_v18, %s3183_s18 }
 0x239   : > { %2010 = vst.msk [vmem:[%s4637_s6 + $0xa0] sm:$0xff] %vm1512_vm4, %v1914_v38  ;;  %2024 = vst.msk [vmem:[%s4637_s6 + $0x180] sm:$0xff] %vm1512_vm4, %v1970_v8  ;;  %v1917_v13 = vadd.f32 %v2440_v52, %v4632_v24  ;;  %v1908_v55 = vpop.f32.mrb[11].mxu0  ;;  %v1973_v17 = vadd.f32 %v4632_v24, %v1972_v2 }
 0x23a   : > { %2008 = vst.msk [vmem:[%s4637_s6 + $0x80] sm:$0xff] %vm1512_vm4, %v1906_v36  ;;  %2027 = vst.msk [vmem:[%s4637_s6 + $0x1a8] sm:$0xff] %vm1512_vm4, %v1981_v28  ;;  %v1909_v15 = vadd.f32 %v4632_v24, %v1908_v55  ;;  %2118 = vrot.lane.b32.xlu1 %v1981_v28, %s3183_s18 }
 0x23b   : > { %2011 = vst.msk [vmem:[%s4637_s6 + $0xa8] sm:$0xff] %vm1512_vm4, %v1917_v13  ;;  %2025 = vst.msk [vmem:[%s4637_s6 + $0x188] sm:$0xff] %vm1512_vm4, %v1973_v17 }
 0x23c   : > { %2009 = vst.msk [vmem:[%s4637_s6 + $0x88] sm:$0xff] %vm1512_vm4, %v1909_v15  ;;  %2112 = vrot.lane.b32.xlu0 %v1970_v8, %s3183_s18 }
 0x23e   : > { %2114 = vrot.lane.b32.xlu1 %v1973_v17, %s3183_s18 }
 0x240   : > { %2084 = vrot.lane.b32.xlu0 %v1914_v38, %s3183_s18 }
 0x242   : > { %2086 = vrot.lane.b32.xlu1 %v1917_v13, %s3183_s18 }
 0x244   : > { %2080 = vrot.lane.b32.xlu0 %v1906_v36, %s3183_s18 }
 0x246   : > { %2082 = vrot.lane.b32.xlu1 %v1909_v15, %s3183_s18 }
 0x25d   : > { %v2459_v16 = vpop.f32.mrb[12].mxu1 }
 0x25e   : > { %v2443_v0 = vpop.f32.mrb[12].mxu0  ;;  %v1994_v40 = vadd.f32 %v2459_v16, %v4632_v24  ;;  %v1985_v37 = vpop.f32.mrb[13].mxu1 }
 0x25f   : > { %v1930_v43 = vadd.f32 %v2443_v0, %v4632_v24  ;;  %v1921_v21 = vpop.f32.mrb[13].mxu0  ;;  %v1986_v47 = vadd.f32 %v4632_v24, %v1985_v37  ;;  %v2460_v60 = vpop.f32.mrb[14].mxu1 }
 0x260   : > { %2030 = vst.msk [vmem:[%s4637_s6 + $0x1e0] sm:$0xff] %vm1512_vm4, %v1994_v40  ;;  %v1922_v5 = vadd.f32 %v4632_v24, %v1921_v21  ;;  %v2444_v11 = vpop.f32.mrb[14].mxu0  ;;  %v1997_v57 = vadd.f32 %v2460_v60, %v4632_v24  ;;  %v1988_v31 = vpop.f32.mrb[15].mxu1 }
 0x261   : > { %2014 = vst.msk [vmem:[%s4637_s6 + $0xe0] sm:$0xff] %vm1512_vm4, %v1930_v43  ;;  %2028 = vst.msk [vmem:[%s4637_s6 + $0x1c0] sm:$0xff] %vm1512_vm4, %v1986_v47  ;;  %v1933_v54 = vadd.f32 %v2444_v11, %v4632_v24  ;;  %v1924_v44 = vpop.f32.mrb[15].mxu0  ;;  %v1989_v59 = vadd.f32 %v4632_v24, %v1988_v31  ;;  %2120 = vrot.lane.b32.xlu0 %v1986_v47, %s3183_s18 }
 0x262   : > { %2012 = vst.msk [vmem:[%s4637_s6 + $0xc0] sm:$0xff] %vm1512_vm4, %v1922_v5  ;;  %2031 = vst.msk [vmem:[%s4637_s6 + $0x1e8] sm:$0xff] %vm1512_vm4, %v1997_v57  ;;  %v1925_v46 = vadd.f32 %v4632_v24, %v1924_v44 }
 0x263   : > { %2015 = vst.msk [vmem:[%s4637_s6 + $0xe8] sm:$0xff] %vm1512_vm4, %v1933_v54  ;;  %2029 = vst.msk [vmem:[%s4637_s6 + $0x1c8] sm:$0xff] %vm1512_vm4, %v1989_v59  ;;  %v2101_v50 = vpop.permute.xlu0 %2100  ;;  %2122 = vrot.lane.b32.xlu1 %v1989_v59, %s3183_s18 }
 0x264   : > { %2013 = vst.msk [vmem:[%s4637_s6 + $0xc8] sm:$0xff] %vm1512_vm4, %v1925_v46  ;;  %2382 = vst.msk [vmem:[%s4637_s6 + $0x130] sm:$0xff] %vm1512_vm4, %v2101_v50 }
 0x265   : > { %v2103_v20 = vpop.permute.xlu1 %2102  ;;  %2092 = vrot.lane.b32.xlu0 %v1930_v43, %s3183_s18 }
 0x266   : > { %2383 = vst.msk [vmem:[%s4637_s6 + $0x138] sm:$0xff] %vm1512_vm4, %v2103_v20 }
 0x267   : > { %v2097_v24 = vpop.permute.xlu0 %2096  ;;  %2094 = vrot.lane.b32.xlu1 %v1933_v54, %s3183_s18 }
 0x268   : > { %2380 = vst.msk [vmem:[%s4637_s6 + $0x110] sm:$0xff] %vm1512_vm4, %v2097_v24 }
 0x269   : > { %v2099_v32 = vpop.permute.xlu1 %2098  ;;  %2088 = vrot.lane.b32.xlu0 %v1922_v5, %s3183_s18 }
 0x26a   : > { %2381 = vst.msk [vmem:[%s4637_s6 + $0x118] sm:$0xff] %vm1512_vm4, %v2099_v32 }
 0x26b   : > { %v2069_v58 = vpop.permute.xlu0 %2068  ;;  %2090 = vrot.lane.b32.xlu1 %v1925_v46, %s3183_s18 }
 0x26c   : > { %2366 = vst.msk [vmem:[%s4637_s6 + $0x30] sm:$0xff] %vm1512_vm4, %v2069_v58 }
 0x26d   : > { %v2071_v49 = vpop.permute.xlu1 %2070  ;;  %2124 = vrot.lane.b32.xlu0 %v1994_v40, %s3183_s18 }
 0x26e   : > { %2367 = vst.msk [vmem:[%s4637_s6 + $0x38] sm:$0xff] %vm1512_vm4, %v2071_v49 }
 0x26f   : > { %v2065_v30 = vpop.permute.xlu0 %2064  ;;  %2126 = vrot.lane.b32.xlu1 %v1997_v57, %s3183_s18 }
 0x270   : > { %2364 = vst.msk [vmem:[%s4637_s6 + $0x10] sm:$0xff] %vm1512_vm4, %v2065_v30 }
 0x271   : > { %v2067_v41 = vpop.permute.xlu1 %2066 }
 0x272   : > { %2365 = vst.msk [vmem:[%s4637_s6 + $0x18] sm:$0xff] %vm1512_vm4, %v2067_v41 }
 0x287   : > { %v2109_v61 = vpop.permute.xlu0 %2108 }
 0x288   : > { %2386 = vst.msk [vmem:[%s4637_s6 + $0x170] sm:$0xff] %vm1512_vm4, %v2109_v61 }
 0x289   : > { %v2111_v62 = vpop.permute.xlu1 %2110 }
 0x28a   : > { %2387 = vst.msk [vmem:[%s4637_s6 + $0x178] sm:$0xff] %vm1512_vm4, %v2111_v62 }
 0x28b   : > { %v2105_v23 = vpop.permute.xlu0 %2104 }
 0x28c   : > { %2384 = vst.msk [vmem:[%s4637_s6 + $0x150] sm:$0xff] %vm1512_vm4, %v2105_v23 }
 0x28d   : > { %v2107_v29 = vpop.permute.xlu1 %2106 }
 0x28e   : > { %2385 = vst.msk [vmem:[%s4637_s6 + $0x158] sm:$0xff] %vm1512_vm4, %v2107_v29 }
 0x28f   : > { %v2077_v1 = vpop.permute.xlu0 %2076 }
 0x290   : > { %2370 = vst.msk [vmem:[%s4637_s6 + $0x70] sm:$0xff] %vm1512_vm4, %v2077_v1 }
 0x291   : > { %v2079_v51 = vpop.permute.xlu1 %2078 }
 0x292   : > { %2371 = vst.msk [vmem:[%s4637_s6 + $0x78] sm:$0xff] %vm1512_vm4, %v2079_v51 }
 0x293   : > { %v2073_v6 = vpop.permute.xlu0 %2072 }
 0x294   : > { %2368 = vst.msk [vmem:[%s4637_s6 + $0x50] sm:$0xff] %vm1512_vm4, %v2073_v6 }
 0x295   : > { %v2075_v34 = vpop.permute.xlu1 %2074 }
 0x296   : > { %2369 = vst.msk [vmem:[%s4637_s6 + $0x58] sm:$0xff] %vm1512_vm4, %v2075_v34 }
 0x2aa   : > { %v2117_v53 = vpop.permute.xlu0 %2116 }
 0x2ab   : > { %2390 = vst.msk [vmem:[%s4637_s6 + $0x1b0] sm:$0xff] %vm1512_vm4, %v2117_v53 }
 0x2ac   : > { %v2119_v3 = vpop.permute.xlu1 %2118 }
 0x2ad   : > { %2391 = vst.msk [vmem:[%s4637_s6 + $0x1b8] sm:$0xff] %vm1512_vm4, %v2119_v3 }
 0x2ae   : > { %v2113_v14 = vpop.permute.xlu0 %2112 }
 0x2af   : > { %2388 = vst.msk [vmem:[%s4637_s6 + $0x190] sm:$0xff] %vm1512_vm4, %v2113_v14 }
 0x2b0   : > { %v2115_v19 = vpop.permute.xlu1 %2114 }
 0x2b1   : > { %2389 = vst.msk [vmem:[%s4637_s6 + $0x198] sm:$0xff] %vm1512_vm4, %v2115_v19 }
 0x2b2   : > { %v2085_v35 = vpop.permute.xlu0 %2084 }
 0x2b3   : > { %2374 = vst.msk [vmem:[%s4637_s6 + $0xb0] sm:$0xff] %vm1512_vm4, %v2085_v35 }
 0x2b4   : > { %v2087_v4 = vpop.permute.xlu1 %2086 }
 0x2b5   : > { %2375 = vst.msk [vmem:[%s4637_s6 + $0xb8] sm:$0xff] %vm1512_vm4, %v2087_v4 }
 0x2b6   : > { %v2081_v27 = vpop.permute.xlu0 %2080 }
 0x2b7   : > { %2372 = vst.msk [vmem:[%s4637_s6 + $0x90] sm:$0xff] %vm1512_vm4, %v2081_v27 }
 0x2b8   : > { %v2083_v45 = vpop.permute.xlu1 %2082 }
 0x2b9   : > { %2373 = vst.msk [vmem:[%s4637_s6 + $0x98] sm:$0xff] %vm1512_vm4, %v2083_v45 }
 0x2d3   : > { %v2121_v22 = vpop.permute.xlu0 %2120 }
 0x2d4   : > { %2392 = vst.msk [vmem:[%s4637_s6 + $0x1d0] sm:$0xff] %vm1512_vm4, %v2121_v22 }
 0x2d5   : > { %v2123_v9 = vpop.permute.xlu1 %2122 }
 0x2d6   : > { %2393 = vst.msk [vmem:[%s4637_s6 + $0x1d8] sm:$0xff] %vm1512_vm4, %v2123_v9 }
 0x2d7   : > { %v2093_v33 = vpop.permute.xlu0 %2092 }
 0x2d8   : > { %2378 = vst.msk [vmem:[%s4637_s6 + $0xf0] sm:$0xff] %vm1512_vm4, %v2093_v33 }
 0x2d9   : > { %v2095_v26 = vpop.permute.xlu1 %2094 }
 0x2da   : > { %2379 = vst.msk [vmem:[%s4637_s6 + $0xf8] sm:$0xff] %vm1512_vm4, %v2095_v26 }
 0x2db   : > { %v2089_v7 = vpop.permute.xlu0 %2088 }
 0x2dc   : > { %2376 = vst.msk [vmem:[%s4637_s6 + $0xd0] sm:$0xff] %vm1512_vm4, %v2089_v7 }
 0x2dd   : > { %v2091_v56 = vpop.permute.xlu1 %2090 }
 0x2de   : > { %2377 = vst.msk [vmem:[%s4637_s6 + $0xd8] sm:$0xff] %vm1512_vm4, %v2091_v56 }
 0x2df   : > { %v2125_v48 = vpop.permute.xlu0 %2124 }
 0x2e0   : > { %2394 = vst.msk [vmem:[%s4637_s6 + $0x1f0] sm:$0xff] %vm1512_vm4, %v2125_v48 }
 0x2e1   : > { %v2127_v42 = vpop.permute.xlu1 %2126 }
 0x2e2   : > { %2395 = vst.msk [vmem:[%s4637_s6 + $0x1f8] sm:$0xff] %vm1512_vm4, %v2127_v42 }
 0x2e3 PF: > { %s15_s20 = sadd.s32 1, %s3173_s20   ;;  %s5023_s18 = smov %s3169_s19 }
 0x2e4   : > { %p12_p5 = scmp.ge.s32.totalorder %s15_s20, 4   ;;  %s5024_s19 = smov %s5026_s21 }
 0x2e6   :  { %14 = sbr.rel (!%p12_p5) target bundleno = 2 (0x2), region = 77 }

</bundles_post_ra>
